<compile_context>
chip_gen: v5e
topology: v5e:2x2
jax: 0.10.0
libtpu: 0.0.40
codegen_flags: <defaults>
</compile_context>

<pallas_src>
import jax
import jax.numpy as jnp
from jax import lax
from jax.experimental import pallas as pl
from jax.experimental.pallas import tpu as pltpu

C = 64            # in/out channels (fixed by the module)
KH = KW = 3       # conv kernel size
NEG_SLOPE = 0.2   # LeakyReLU negative slope


def _conv_block_kernel(x_ref, w_ref, o_ref):
    """One (batch, H-strip) tile.

    x_ref: (1, 1, TILE_H + 2, W + 2, C) bf16 -- padded input strip (2-row halo)
    w_ref: (KH, KW * C, C)              bf16 -- weights packed as [dh, dw*C + ci, co]
    o_ref: (1, TILE_H, W, C)            f32  -- output strip
    """
    tile_h, w_out, c_out = o_ref.shape[1], o_ref.shape[2], o_ref.shape[3]

    # Load the strip once.  The shifted slices / concat are done in f32 (robust
    # relayout path); matmul operands are cast back to bf16 just before the MXU.
    x = x_ref[0, 0, :, :, :].astype(jnp.float32)              # (TILE_H+2, W+2, C)

    # Fuse the 3 horizontal taps into the contraction dimension:
    #   patch[h, w, dw*C + ci] == x[h, w + dw, ci]
    patch = jnp.concatenate(
        [x[:, 0:w_out, :], x[:, 1:w_out + 1, :], x[:, 2:w_out + 2, :]],
        axis=-1).astype(jnp.bfloat16)                          # (TILE_H+2, W, 3*C)

    acc = jnp.zeros((tile_h, w_out, c_out), jnp.float32)
    for dh in range(KH):
        # Vertical taps are cheap slices along the leading (untiled) axis.
        acc = acc + lax.dot_general(
            patch[dh:dh + tile_h],                             # (TILE_H, W, 3*C) bf16
            w_ref[dh, :, :],                                   # (3*C, C)         bf16
            dimension_numbers=(((2,), (0,)), ((), ())),
            preferred_element_type=jnp.float32)

    # LeakyReLU(0.2)
    acc = jnp.where(acc >= 0, acc, NEG_SLOPE * acc)
    o_ref[...] = acc[None].astype(o_ref.dtype)


def _pick_tile_h(h, w):
    """Largest row-strip height (dividing h) whose working set stays small.

    Budget targets the f32 patch temp ~ (TILE_H+2) * W * 3C * 4 bytes so the
    per-step working set (plus double-buffered blocks) sits well under VMEM.
    """
    budget = 4 * 1024 * 1024
    max_t = max(1, budget // (w * 3 * C * 4) - 2)
    if h <= max_t:
        return h
    best = 1
    for t in range(1, h + 1):
        if h % t == 0 and t <= max_t:
            best = t
    return best


@jax.jit
def conv_block(x_nchw, w_oihw):
    """Forward pass of _Conv_Block.

    x_nchw: (N, 64, H, W) float32;  w_oihw: (64, 64, 3, 3) float32.
    Returns (N, 64, H, W) float32.
    """
    n, c_in, h, w = x_nchw.shape
    assert c_in == C and w_oihw.shape == (C, C, KH, KW)

    tile_h = _pick_tile_h(h, w)
    n_strips = h // tile_h
    assert h % tile_h == 0

    # ---- input prep: bf16 cast + NHWC + zero pad (+ halo strips) -------------
    # These layout ops fuse into one XLA pass over the (now half-size) input.
    xb = jnp.transpose(x_nchw.astype(jnp.bfloat16), (0, 2, 3, 1))   # (N, H, W, C)
    xp = jnp.pad(xb, ((0, 0), (1, 1), (1, 1), (0, 0)))              # (N, H+2, W+2, C)
    if n_strips == 1:
        x_strips = xp[:, None]                                      # (N, 1, H+2, W+2, C)
    else:
        x_strips = jnp.stack(
            [xp[:, t * tile_h:t * tile_h + tile_h + 2] for t in range(n_strips)],
            axis=1)                                                 # (N, S, TILE_H+2, W+2, C)

    # ---- weight prep: OIHW -> (dh, dw*Cin + ci, co), bf16 --------------------
    w_pack = jnp.transpose(w_oihw, (2, 3, 1, 0)).reshape(KH, KW * C, C)
    w_pack = w_pack.astype(jnp.bfloat16)

    flops = 2 * n * h * w * C * C * KH * KW
    bytes_accessed = x_strips.size * 2 + w_pack.size * 2 + n * h * w * C * 4
    cost = pl.CostEstimate(flops=flops, transcendentals=0,
                           bytes_accessed=bytes_accessed)

    out_nhwc = pl.pallas_call(
        _conv_block_kernel,
        out_shape=jax.ShapeDtypeStruct((n, h, w, C), jnp.float32),
        grid_spec=pltpu.PrefetchScalarGridSpec(
            num_scalar_prefetch=0,
            grid=(n, n_strips),
            in_specs=[
                pl.BlockSpec((1, 1, tile_h + 2, w + 2, C),
                             lambda b, t: (b, t, 0, 0, 0)),
                pl.BlockSpec((KH, KW * C, C), lambda b, t: (0, 0, 0)),
            ],
            out_specs=pl.BlockSpec((1, tile_h, w, C), lambda b, t: (b, t, 0, 0)),
        ),
        compiler_params=pltpu.CompilerParams(
            dimension_semantics=("parallel", "parallel"),
            vmem_limit_bytes=48 * 1024 * 1024),
        cost_estimate=cost,
    )(x_strips, w_pack)

    # Back to the module's NCHW interface.  (In a full LapSRN port, keeping the
    # network NHWC end-to-end removes these transposes entirely.)
    return jnp.transpose(out_nhwc, (0, 3, 1, 2))


def _reference(x, w):
    """XLA reference: Conv2d(stride=1, pad=1, no bias) + LeakyReLU(0.2)."""
    ref = lax.conv_general_dilated(
        x, w, window_strides=(1, 1), padding="SAME",
        dimension_numbers=("NCHW", "OIHW", "NCHW"),
        precision=lax.Precision.HIGHEST)
    return jnp.where(ref >= 0, ref, NEG_SLOPE * ref)


if __name__ == "__main__":
    key = jax.random.PRNGKey(0)
    kx, kw_key, kx2 = jax.random.split(key, 3)

    # Conv2d(64, 64, 3, 3, bias=False) weights (deterministic synthetic init).
    fan_in = C * KH * KW
    w = jax.random.normal(kw_key, (C, C, KH, KW), jnp.float32) * (2.0 / fan_in) ** 0.5

    # Case 1: small image, single H strip.
    x = jax.random.normal(kx, (2, C, 16, 16), jnp.float32)
    out = jax.block_until_ready(conv_block(x, w))
    ref = _reference(x.astype(jnp.bfloat16).astype(jnp.float32),
                     w.astype(jnp.bfloat16).astype(jnp.float32))
    assert out.shape == x.shape and out.dtype == jnp.float32
    assert jnp.allclose(out, ref, atol=2e-2, rtol=2e-2), \
        float(jnp.max(jnp.abs(out - ref)))

    # Case 2: wider image exercising the multi-strip halo path (TILE_H < H).
    x2 = jax.random.normal(kx2, (1, C, 48, 192), jnp.float32)
    out2 = jax.block_until_ready(conv_block(x2, w))
    ref2 = _reference(x2.astype(jnp.bfloat16).astype(jnp.float32),
                      w.astype(jnp.bfloat16).astype(jnp.float32))
    assert out2.shape == x2.shape
    assert jnp.allclose(out2, ref2, atol=2e-2, rtol=2e-2), \
        float(jnp.max(jnp.abs(out2 - ref2)))

    print("KERNEL_OK")
</pallas_src>

<mosaic_0001>
module attributes {stable_mosaic.version = 11 : i64} {
  func.func @_conv_block_kernel(%arg0: i32, %arg1: i32, %arg2: memref<1x1x18x18x64xbf16, #tpu.memory_space<vmem>>, %arg3: memref<3x192x64xbf16, #tpu.memory_space<vmem>>, %arg4: memref<1x16x16x64xf32, #tpu.memory_space<vmem>>) attributes {dimension_semantics = [#tpu.dimension_semantics<parallel>, #tpu.dimension_semantics<parallel>], iteration_bounds = array<i64: 2, 1>, scalar_prefetch = 0 : i64, scratch_operands = 0 : i64, tpu.core_type = #tpu.core_type<tc>, window_params = [{transform_indices = @transform_0, window_bounds = array<i64: 1, 1, 18, 18, 64>}, {pipeline_mode = #tpu.pipeline_mode<synchronous>, transform_indices = @transform_1, window_bounds = array<i64: 3, 192, 64>}, {transform_indices = @transform_2, window_bounds = array<i64: 1, 16, 16, 64>}]} {
    %c0 = arith.constant 0 : index
    %c0_0 = arith.constant 0 : index
    %c0_1 = arith.constant 0 : index
    %c0_2 = arith.constant 0 : index
    %c0_3 = arith.constant 0 : index
    %0 = vector.load %arg2[%c0, %c0_0, %c0_1, %c0_2, %c0_3] : memref<1x1x18x18x64xbf16, #tpu.memory_space<vmem>>, vector<1x1x18x18x64xbf16>
    %1 = vector.shape_cast %0 : vector<1x1x18x18x64xbf16> to vector<18x18x64xbf16>
    %2 = arith.extf %1 : vector<18x18x64xbf16> to vector<18x18x64xf32>
    %3 = vector.extract_strided_slice %2 {offsets = [0, 0, 0], sizes = [18, 16, 64], strides = [1, 1, 1]} : vector<18x18x64xf32> to vector<18x16x64xf32>
    %4 = vector.extract_strided_slice %2 {offsets = [0, 1, 0], sizes = [18, 16, 64], strides = [1, 1, 1]} : vector<18x18x64xf32> to vector<18x16x64xf32>
    %5 = vector.extract_strided_slice %2 {offsets = [0, 2, 0], sizes = [18, 16, 64], strides = [1, 1, 1]} : vector<18x18x64xf32> to vector<18x16x64xf32>
    %6 = tpu.concatenate %3, %4, %5 in 2 : vector<18x16x64xf32>, vector<18x16x64xf32>, vector<18x16x64xf32> -> vector<18x16x192xf32>
    %7 = arith.truncf %6 : vector<18x16x192xf32> to vector<18x16x192xbf16>
    %cst = arith.constant 0.000000e+00 : f32
    %8 = vector.broadcast %cst : f32 to vector<16x16x64xf32>
    %9 = vector.extract_strided_slice %7 {offsets = [0, 0, 0], sizes = [16, 16, 192], strides = [1, 1, 1]} : vector<18x16x192xbf16> to vector<16x16x192xbf16>
    %c0_4 = arith.constant 0 : index
    %c0_5 = arith.constant 0 : index
    %c0_6 = arith.constant 0 : index
    %10 = vector.load %arg3[%c0_4, %c0_5, %c0_6] : memref<3x192x64xbf16, #tpu.memory_space<vmem>>, vector<1x192x64xbf16>
    %11 = vector.shape_cast %10 : vector<1x192x64xbf16> to vector<192x64xbf16>
    %cst_7 = arith.constant dense<0.000000e+00> : vector<16x16x64xf32>
    %12 = tpu.matmul %9, %11, %cst_7 {dimension_numbers = #tpu.dot_dimension_numbers<[2], [0], [0, 1], [1], [0, 0, 0, 1, 1, 1], [], []>} : vector<16x16x192xbf16>, vector<192x64xbf16>, vector<16x16x64xf32> -> vector<16x16x64xf32>
    %13 = arith.addf %8, %12 : vector<16x16x64xf32>
    %14 = vector.extract_strided_slice %7 {offsets = [1, 0, 0], sizes = [16, 16, 192], strides = [1, 1, 1]} : vector<18x16x192xbf16> to vector<16x16x192xbf16>
    %c1 = arith.constant 1 : index
    %c0_8 = arith.constant 0 : index
    %c0_9 = arith.constant 0 : index
    %15 = vector.load %arg3[%c1, %c0_8, %c0_9] : memref<3x192x64xbf16, #tpu.memory_space<vmem>>, vector<1x192x64xbf16>
    %16 = vector.shape_cast %15 : vector<1x192x64xbf16> to vector<192x64xbf16>
    %cst_10 = arith.constant dense<0.000000e+00> : vector<16x16x64xf32>
    %17 = tpu.matmul %14, %16, %cst_10 {dimension_numbers = #tpu.dot_dimension_numbers<[2], [0], [0, 1], [1], [0, 0, 0, 1, 1, 1], [], []>} : vector<16x16x192xbf16>, vector<192x64xbf16>, vector<16x16x64xf32> -> vector<16x16x64xf32>
    %18 = arith.addf %13, %17 : vector<16x16x64xf32>
    %19 = vector.extract_strided_slice %7 {offsets = [2, 0, 0], sizes = [16, 16, 192], strides = [1, 1, 1]} : vector<18x16x192xbf16> to vector<16x16x192xbf16>
    %c2 = arith.constant 2 : index
    %c0_11 = arith.constant 0 : index
    %c0_12 = arith.constant 0 : index
    %20 = vector.load %arg3[%c2, %c0_11, %c0_12] : memref<3x192x64xbf16, #tpu.memory_space<vmem>>, vector<1x192x64xbf16>
    %21 = vector.shape_cast %20 : vector<1x192x64xbf16> to vector<192x64xbf16>
    %cst_13 = arith.constant dense<0.000000e+00> : vector<16x16x64xf32>
    %22 = tpu.matmul %19, %21, %cst_13 {dimension_numbers = #tpu.dot_dimension_numbers<[2], [0], [0, 1], [1], [0, 0, 0, 1, 1, 1], [], []>} : vector<16x16x192xbf16>, vector<192x64xbf16>, vector<16x16x64xf32> -> vector<16x16x64xf32>
    %23 = arith.addf %18, %22 : vector<16x16x64xf32>
    %cst_14 = arith.constant 0.000000e+00 : f32
    %24 = vector.broadcast %cst_14 : f32 to vector<16x16x64xf32>
    %25 = arith.cmpf oge, %23, %24 : vector<16x16x64xf32>
    %cst_15 = arith.constant 2.000000e-01 : f32
    %26 = vector.broadcast %cst_15 : f32 to vector<16x16x64xf32>
    %27 = arith.mulf %26, %23 : vector<16x16x64xf32>
    %28 = arith.select %25, %23, %27 : vector<16x16x64xi1>, vector<16x16x64xf32>
    %29 = vector.shape_cast %28 : vector<16x16x64xf32> to vector<1x16x16x64xf32>
    %c0_16 = arith.constant 0 : index
    %c0_17 = arith.constant 0 : index
    %c0_18 = arith.constant 0 : index
    %c0_19 = arith.constant 0 : index
    %30 = vector.load %arg4[%c0_16, %c0_17, %c0_18, %c0_19] : memref<1x16x16x64xf32, #tpu.memory_space<vmem>>, vector<1x16x16x64xf32>
    tpu.vector_store %arg4[%c0_16, %c0_17, %c0_18, %c0_19], %29 {strides = array<i32>} : memref<1x16x16x64xf32, #tpu.memory_space<vmem>>, vector<1x16x16x64xf32>,
    return
  }
  func.func @transform_0(%arg0: i32, %arg1: i32) -> (i32, i32, i32, i32, i32) {
    %c0_i32 = arith.constant 0 : i32
    %c0_i32_0 = arith.constant 0 : i32
    %c0_i32_1 = arith.constant 0 : i32
    %c0_i32_2 = arith.constant 0 : i32
    return %arg0, %arg1, %c0_i32, %c0_i32_0, %c0_i32_1 : i32, i32, i32, i32, i32
  }
  func.func @transform_1(%arg0: i32, %arg1: i32) -> (i32, i32, i32) {
    %c0_i32 = arith.constant 0 : i32
    %c0_i32_0 = arith.constant 0 : i32
    %c0_i32_1 = arith.constant 0 : i32
    %c0_i32_2 = arith.constant 0 : i32
    return %c0_i32, %c0_i32_0, %c0_i32_1 : i32, i32, i32
  }
  func.func @transform_2(%arg0: i32, %arg1: i32) -> (i32, i32, i32, i32) {
    %c0_i32 = arith.constant 0 : i32
    %c0_i32_0 = arith.constant 0 : i32
    %c0_i32_1 = arith.constant 0 : i32
    return %arg0, %arg1, %c0_i32, %c0_i32_0 : i32, i32, i32, i32
  }
}

</mosaic_0001>

<bundles_post_ra>
// kernel: conv_block.1
= control target key start
LH: loop header
LB: loop body
LE: loop exit
PB: predicated region body
PF: predicated region fallthrough
CT: control target
= control target key end

     0   :  { %7 = vsyncpa [#allocation3], 0  ;;  %s3917_s0 = inlined_call_operand.vmem [shape: bf16[2,1,18,18,64], index: 0, kind: input, shape index: {}]   ;;  %s3918_s1 = inlined_call_operand.vmem [shape: bf16[3,192,64], index: 1, kind: input, shape index: {}]   ;;  %s3919_s2 = inlined_call_operand.hbm [shape: f32[2,16,16,64], index: 2, kind: output, shape index: {}]  }
   0x1   :  { %9 = vsyncpa [#allocation3 + $0x1], 0  ;;  %s2622_s9 = smov 0   ;;  %s2624_s10 = smov 0  }
   0x2   :  { %s2626_s11 = smov 0   ;;  %s2628_s12 = smov 0  }
   0x3   :  { %s2630_s13 = smov 0   ;;  %s2632_s14 = smov 0  }
   0x4 LB: > { %s2034_s15 = sadd.s32 4294967295, %s2602_s14   ;;  %s2035_s16 = sadd.s32 4294967294, %s2602_s14   ;;  %s2602_s14 = sphi %s2632_s14, %s15_s14   ;;  %s2598_s13 = sphi %s2630_s13, %s4081_s13   ;;  %s2594_s12 = sphi %s2628_s12, %s4080_s12   ;;  %s2590_s11 = sphi %s2626_s11, %s4079_s11   ;;  %s2586_s10 = sphi %s2624_s10, %s4078_s10   ;;  %s2582_s9 = sphi %s2622_s9, %s4077_s9  }
   0x5   : > { %s27_s17 = sadd.s32 1, %s2598_s13  ;;  %s85_s18 = sadd.s32 1, %s2590_s11 }
   0x6   : > { %p29_p0 = scmp.ge.s32.totalorder %s27_s17, 2  ;;  %p95_p1 = scmp.ne.s32.totalorder %s2590_s11, %s2586_s10 }
   0x7   : > { %p96_p2 = scmp.eq.s32.totalorder %s2034_s15, 1  ;;  %p101_p3 = scmp.ne.s32.totalorder %s2586_s10, %s2582_s9 }
   0x8   : > { %s4083_s17 = smov (%p29_p0, %s27_s17), 0  ;;  %p102_p5 = scmp.eq.s32.totalorder %s2035_s16, 1 }
   0x9   : > { %p2662_p4 = por %p96_p2, %p95_p1  ;;  %s80_s20 = ssub.s32 %s2598_s13, %s4083_s17 }
   0xa   : > { %p2038_p6 = scmp.ge.s32.totalorder %s2602_s14, 1  ;;  %p83_p7 = scmp.eq.s32.totalorder %s80_s20, 0 }
   0xb   : > { %p2669_p8 = por %p102_p5, %p101_p3  ;;  %p135_p9 = scmp.lt.s32.totalorder %s2602_s14, 3 }
   0xc   : > { %s2675_s22 = scalar_select %p83_p7, %s2590_s11, %s85_s18  }
   0xd   : > { %p136_p10 = pnand %p2038_p6, %p135_p9 }
   0xf   : > { %139 = sbr.rel (%p136_p10) target bundleno = 697 (0x2b9), region = 28 }
  0x14   : > { %p161_p11 = scmp.lt.s32.totalorder %s2594_s12, 1  ;;  %vm334_vm0 = vcmask 1046528   ;;  %s2604_s28 = smov 64   ;;  %v2305_v47 = vld [vmem:[%s3918_s1 + $0x98] sm:$0xff]  ;;  %v2304_v56 = vld [vmem:[%s3918_s1 + $0x90] sm:$0xff]  ;;  %vm533_vm1 = vcmask 1045504  }
  0x15   : > { %1046 = vmatpush.bf16.msra.mxu0 %v2305_v47  ;;  %v2293_v57 = vld [vmem:[%s3918_s1 + $0x38] sm:$0xff]  ;;  %vm660_vm2 = vcmask 523264   ;;  %s2322_s16 = sshll.u32 %s2594_s12, 8  ;;  %s2544_s4 = scalar_lea.hbm %s3919_s2, 512 }
  0x16   : > { %s162_s23 = scalar_select %p161_p11, %s2594_s12, 1  ;;  %1308 = vmatpush.bf16.msra.mxu2 %v2293_v57 }
  0x18   : > { %s2375_s24 = smul.u32 216, %s162_s23  ;;  %s1948_s23 = scalar_lea.hbm %s3919_s2, %s2322_s16 }
  0x19   : > { %1047 = vmatpush.bf16.msra.mxu0 %v2304_v56  ;;  %s1951_s12 = sshll.u32 %s1948_s23, 4  ;;  %s1952_s12 = int_to_ptr.hbm [resolvable:$true] %s1951_s12 }
  0x1a   : > { %s2682_s27 = scalar_lea.vmem %s3917_s0, %s2375_s24  ;;  %s2538_s26 = sshra.s32 %s1952_s12, 4  ;;  %s2539_s26 = int_to_ptr.hbm [resolvable:$true] %s2538_s26 }
  0x1b   : > { %v199_v0 = vld [vmem:[%s2682_s27 + $0x6c] sm:$0xff]   ;;  %v2686_v1 = vld [vmem:[%s2682_s27 + $0x74] sm:$0x1]  ;;  %v2695_v6 = vld [vmem:[%s2682_s27 + $0x5c] sm:$0x1]  ;;  %s2540_s29 = scalar_lea.hbm %s2539_s26, 256  ;;  %p2545_p1 = scmp.lt.s32.totalorder %s2539_s26, %s3919_s2 }
  0x1c   : > { %v193_v2 = vld [vmem:[%s2682_s27 + $0x54] sm:$0xff]   ;;  %v2689_v3 = vunpack.c.l.bf16 %v199_v0  ;;  %v2691_v4 = vunpack.c.h.bf16 %v199_v0  ;;  %v3928_v5 = vunpack.c.l.bf16 %v2686_v1  ;;  %v2362_v8 = vld [vmem:[%s2682_s27 + $0x60] sm:$0xff]   ;;  %v3931_v10 = vunpack.c.l.bf16 %v2695_v6  ;;  %v2708_v13 = vld [vmem:[%s2682_s27 + $0x68] sm:$0x1]  ;;  %p2541_p12 = scmp.ne.s32.totalorder %s2539_s26, %s2540_s29  ;;  %p2546_p2 = scmp.lt.s32.totalorder %s2544_s4, %s2540_s29 }
  0x1d   : > { %v2697_v7 = vunpack.c.l.bf16 %v193_v2  ;;  %v2700_v9 = vunpack.c.h.bf16 %v193_v2  ;;  %v2703_v11 = vunpack.c.l.bf16 %v2362_v8  ;;  %v2705_v12 = vunpack.c.h.bf16 %v2362_v8  ;;  %v2324_v20 = vld [vmem:[%s2682_s27] sm:$0xff]   ;;  %v2724_v25 = vld [vmem:[%s2682_s27 + $0x8] sm:$0x1]  ;;  %v2359_v26 = vld [vmem:[%s2682_s27 + $0x18] sm:$0xff]  }
  0x1e   : > { %v380_v14 = vrot.slane %v2689_v3, 1  ;;  %v381_v15 = vrot.slane %v2691_v4, 1  ;;  %v383_v16 = vrot.slane %v3928_v5, 1  ;;  %v373_v19 = vrot.slane %v3931_v10, 1  ;;  %v2731_v31 = vld [vmem:[%s2682_s27 + $0x20] sm:$0x1]  ;;  %p2542_p13 = pnand %p2541_p12, %p2662_p4  ;;  %p2547_p3 = por %p2546_p2, %p2545_p1 }
  0x1f   : > { %v370_v17 = vrot.slane %v2697_v7, 1  ;;  %v371_v18 = vrot.slane %v2700_v9, 1  ;;  %v3927_v23 = vunpack.c.l.bf16 %v2708_v13  ;;  %v375_v24 = vrot.slane %v2703_v11, 1  ;;  %v175_v40 = vld [vmem:[%s2682_s27 + $0xc] sm:$0xff]   ;;  %v2753_v45 = vld [vmem:[%s2682_s27 + $0x14] sm:$0x1] }
  0x20   : > { %v382_v21 = vsel %vm334_vm0, %v380_v14, %v381_v15  ;;  %v384_v22 = vsel %vm334_vm0, %v381_v15, %v383_v16  ;;  %v376_v30 = vrot.slane %v2705_v12, 1  ;;  %v2735_v34 = vunpack.c.l.bf16 %v2324_v20  ;;  %v205_v46 = vld [vmem:[%s2682_s27 + $0x84] sm:$0xff]   ;;  %v2771_v55 = vld [vmem:[%s2682_s27 + $0x8c] sm:$0x1]  ;;  %v2363_v62 = vld [vmem:[%s2682_s27 + $0x78] sm:$0xff]   ;;  %p2543_p0 = pneg %p2542_p13 }
  0x21   : > { %v2444_v27 = vpack.i.bf16 %v384_v22, %v382_v21  ;;  %v372_v28 = vsel %vm334_vm0, %v370_v17, %v371_v18  ;;  %v374_v29 = vsel %vm334_vm0, %v371_v18, %v373_v19  ;;  %v378_v33 = vrot.slane %v3927_v23, 1  ;;  %v2790_v14 = vld [vmem:[%s2682_s27 + $0x80] sm:$0x1]  ;;  %v2360_v19 = vld [vmem:[%s2682_s27 + $0x30] sm:$0xff]   ;;  %v2361_v23 = vld [vmem:[%s2682_s27 + $0x48] sm:$0xff]  }
  0x22   : > { %v2434_v32 = vpack.i.bf16 %v374_v29, %v372_v28  ;;  %v2737_v35 = vunpack.c.h.bf16 %v2324_v20  ;;  %v377_v36 = vsel %vm334_vm0, %v375_v24, %v376_v30  ;;  %v3926_v37 = vunpack.c.l.bf16 %v2724_v25  ;;  %p2548_p5 = pnand %p2547_p3, %p2543_p0 }
  0x23   : > { %2445 = vrot.lane.b32.xlu1 %v2444_v27, %s2604_s28  ;;  %v2742_v38 = vunpack.c.l.bf16 %v2359_v26  ;;  %v2744_v39 = vunpack.c.h.bf16 %v2359_v26  ;;  %v379_v41 = vsel %vm334_vm0, %v376_v30, %v378_v33  ;;  %v335_v42 = vrot.slane %v2735_v34, 1  ;;  %v2303_v26 = vld [vmem:[%s3918_s1 + $0x88] sm:$0xff] }
  0x24   : > { %2435 = vrot.lane.b32.xlu0 %v2434_v32, %s2604_s28  ;;  %v336_v43 = vrot.slane %v2737_v35, 1  ;;  %v3925_v44 = vunpack.c.l.bf16 %v2731_v31  ;;  %v338_v48 = vrot.slane %v3926_v37, 1  ;;  %v2766_v53 = vunpack.c.l.bf16 %v175_v40  ;;  %v2817_v32 = vld [vmem:[%s2682_s27 + $0x38] sm:$0x1]  ;;  %1048 = vmatpush.bf16.msra.mxu0 %v2303_v26 }
  0x25   : > { %v345_v49 = vrot.slane %v2742_v38, 1  ;;  %v346_v50 = vrot.slane %v2744_v39, 1  ;;  %v2768_v54 = vunpack.c.h.bf16 %v175_v40  ;;  %v2439_v58 = vpack.i.bf16 %v379_v41, %v377_v36 }
  0x26   : > { %v337_v51 = vsel %vm334_vm0, %v335_v42, %v336_v43  ;;  %v348_v52 = vrot.slane %v3925_v44, 1  ;;  %v339_v59 = vsel %vm334_vm0, %v336_v43, %v338_v48  ;;  %v3932_v60 = vunpack.c.l.bf16 %v2753_v45  ;;  %v2364_v42 = vld [vmem:[%s2682_s27 + $0x90] sm:$0xff]   ;;  %v2365_v44 = vld [vmem:[%s2682_s27 + $0xa8] sm:$0xff]  }
  0x27   : > { %v2781_v61 = vunpack.c.l.bf16 %v205_v46  ;;  %v2449_v63 = vpack.i.bf16 %v339_v59, %v337_v51  ;;  %v2785_v0 = vsel %vm334_vm0, %v345_v49, %v346_v50  ;;  %v340_v2 = vrot.slane %v2766_v53, 1  ;;  %v2832_v49 = vld [vmem:[%s2682_s27 + $0x98] sm:$0x1] }
  0x28   : > { %v341_v8 = vrot.slane %v2768_v54, 1  ;;  %v2793_v15 = vsel %vm334_vm0, %v346_v50, %v348_v52  ;;  %v343_v16 = vrot.slane %v3932_v60, 1  ;;  %v2797_v17 = vunpack.c.h.bf16 %v205_v46  ;;  %v181_v50 = vld [vmem:[%s2682_s27 + $0x24] sm:$0xff]  }
  0x29   : > { %v3922_v18 = vunpack.c.l.bf16 %v2771_v55  ;;  %v390_v21 = vrot.slane %v2781_v61, 1  ;;  %v2803_v22 = vunpack.c.l.bf16 %v2363_v62  ;;  %v2805_v24 = vunpack.c.h.bf16 %v2363_v62 }
  0x2a   : > { %v342_v20 = vsel %vm334_vm0, %v340_v2, %v341_v8  ;;  %v344_v27 = vsel %vm334_vm0, %v341_v8, %v343_v16  ;;  %v391_v28 = vrot.slane %v2797_v17, 1  ;;  %v3924_v30 = vunpack.c.l.bf16 %v2790_v14  ;;  %v2849_v8 = vld [vmem:[%s2682_s27 + $0x2c] sm:$0x1]  ;;  %v2292_v16 = vld [vmem:[%s3918_s1 + $0x30] sm:$0xff] }
  0x2b   : > { %2450 = vrot.lane.b32.xlu1 %v2449_v63, %s2604_s28  ;;  %v393_v29 = vrot.slane %v3922_v18, 1  ;;  %v2454_v33 = vpack.i.bf16 %v344_v27, %v342_v20  ;;  %v385_v36 = vrot.slane %v2803_v22, 1  ;;  %v386_v40 = vrot.slane %v2805_v24, 1  ;;  %v2864_v27 = vld [vmem:[%s3918_s1 + $0x58] sm:$0xff]  ;;  %1309 = vmatpush.bf16.msra.mxu2 %v2292_v16  ;;  %v2892_v16 = vld [vmem:[%s3918_s1 + $0x50] sm:$0xff] }
  0x2c   : > { %2440 = vrot.lane.b32.xlu0 %v2439_v58, %s2604_s28  ;;  %v2822_v41 = vunpack.c.l.bf16 %v2360_v19  ;;  %v392_v43 = vsel %vm334_vm0, %v390_v21, %v391_v28  ;;  %v388_v47 = vrot.slane %v3924_v30, 1  ;;  %v2829_v48 = vunpack.c.h.bf16 %v2360_v19  ;;  %v2302_v58 = vld [vmem:[%s3918_s1 + $0x80] sm:$0xff]  ;;  %2371 = vmatpush.bf16.msra.mxu3 %v2864_v27 }
  0x2d   : > { %v394_v46 = vsel %vm334_vm0, %v391_v28, %v393_v29  ;;  %2455 = vrot.lane.b32.xlu2 %v2454_v33, %s2604_s28  ;;  %v387_v52 = vsel %vm334_vm0, %v385_v36, %v386_v40  ;;  %v3921_v56 = vunpack.c.l.bf16 %v2817_v32  ;;  %v2844_v63 = vunpack.c.l.bf16 %v2364_v42  ;;  %1049 = vmatpush.bf16.msra.mxu0 %v2302_v58 }
  0x2e   : > { %v2469_v51 = vpack.i.bf16 %v394_v46, %v392_v43  ;;  %v355_v57 = vrot.slane %v2822_v41, 1  ;;  %v389_v59 = vsel %vm334_vm0, %v386_v40, %v388_v47  ;;  %v356_v62 = vrot.slane %v2829_v48, 1  ;;  %v187_v43 = vld [vmem:[%s2682_s27 + $0x3c] sm:$0xff]   ;;  %v2879_v46 = vld [vmem:[%s2682_s27 + $0x44] sm:$0x1] }
  0x2f   : > { %v2846_v2 = vunpack.c.h.bf16 %v2364_v42  ;;  %v2464_v19 = vpack.i.bf16 %v2793_v15, %v2785_v0  ;;  %v358_v20 = vrot.slane %v3921_v56, 1  ;;  %v3920_v21 = vunpack.c.l.bf16 %v2832_v49  ;;  %v2291_v0 = vld [vmem:[%s3918_s1 + $0x28] sm:$0xff]  ;;  %v2301_v47 = vld [vmem:[%s3918_s1 + $0x78] sm:$0xff] }
  0x30   : > { %v2859_v26 = vunpack.c.l.bf16 %v181_v50  ;;  %v395_v28 = vrot.slane %v2844_v63, 1  ;;  %v2868_v33 = vunpack.c.h.bf16 %v181_v50  ;;  %v2459_v15 = vpack.i.bf16 %v389_v59, %v387_v52  ;;  %v211_v56 = vld [vmem:[%s2682_s27 + $0x9c] sm:$0xff]   ;;  %1310 = vmatpush.bf16.msra.mxu2 %v2291_v0  ;;  %2372 = vmatpush.bf16.msra.mxu3 %v2892_v16 }
  0x31   : > { %v396_v29 = vrot.slane %v2846_v2, 1  ;;  %v398_v36 = vrot.slane %v3920_v21, 1  ;;  %v3923_v40 = vunpack.c.l.bf16 %v2849_v8  ;;  %v357_v50 = vsel %vm334_vm0, %v355_v57, %v356_v62  ;;  %1050 = vmatpush.bf16.msra.mxu0 %v2301_v47 }
  0x32   : > { %v350_v42 = vrot.slane %v2859_v26, 1  ;;  %v359_v52 = vsel %vm334_vm0, %v356_v62, %v358_v20  ;;  %v351_v59 = vrot.slane %v2868_v33, 1  ;;  %v2903_v62 = vunpack.c.l.bf16 %v187_v43 }
  0x33   : > { %2470 = vrot.lane.b32.xlu1 %v2469_v51, %s2604_s28  ;;  %v397_v58 = vsel %vm334_vm0, %v395_v28, %v396_v29  ;;  %v353_v21 = vrot.slane %v3923_v40, 1  ;;  %v2900_v51 = vld [vmem:[%s2682_s27 + $0xa4] sm:$0x1]  ;;  %v399_v57 = vsel %vm334_vm0, %v396_v29, %v398_v36  ;;  %v2905_v20 = vunpack.c.h.bf16 %v187_v43  ;;  %v2300_v29 = vld [vmem:[%s3918_s1 + $0x70] sm:$0xff] }
  0x34   : > { %2465 = vrot.lane.b32.xlu0 %v2464_v19, %s2604_s28  ;;  %v3930_v18 = vunpack.c.l.bf16 %v2879_v46  ;;  %v2290_v19 = vld [vmem:[%s3918_s1 + $0x20] sm:$0xff]  ;;  %v2484_v28 = vpack.i.bf16 %v359_v52, %v357_v50  ;;  %v352_v40 = vsel %vm334_vm0, %v350_v42, %v351_v59  ;;  %v2917_v43 = vunpack.c.l.bf16 %v211_v56  ;;  %v2925_v50 = vld [vmem:[%s2682_s27 + $0xb0] sm:$0x1] }
  0x35   : > { %2460 = vrot.lane.b32.xlu2 %v2459_v15, %s2604_s28  ;;  %v354_v36 = vsel %vm334_vm0, %v351_v59, %v353_v21  ;;  %v2919_v30 = vunpack.c.h.bf16 %v211_v56  ;;  %v3929_v0 = vunpack.c.l.bf16 %v2900_v51  ;;  %v2479_v15 = vpack.i.bf16 %v399_v57, %v397_v58  ;;  %3960 = vst [vmem:[#allocation5_spill] sm:$0xff] %v2925_v50  ;;  %1311 = vmatpush.bf16.msra.mxu2 %v2290_v19 }
  0x36   : > { %v360_v42 = vrot.slane %v2903_v62, 1  ;;  %v361_v47 = vrot.slane %v2905_v20, 1  ;;  %v363_v21 = vrot.slane %v3930_v18, 1  ;;  %v2474_v56 = vpack.i.bf16 %v354_v36, %v352_v40  ;;  %1051 = vmatpush.bf16.msra.mxu0 %v2300_v29  ;;  %v2944_v40 = vld [vmem:[%s2682_s27 + $0x50] sm:$0x1] }
  0x37   : > { %v2931_v52 = vunpack.c.l.bf16 %v2365_v44  ;;  %v2933_v59 = vunpack.c.h.bf16 %v2365_v44  ;;  %v400_v58 = vrot.slane %v2917_v43, 1  ;;  %v401_v57 = vrot.slane %v2919_v30, 1  ;;  %3963 = vst [vmem:[#allocation8_spill] sm:$0xff] %v2944_v40 }
  0x38   : > { %v403_v37 = vrot.slane %v3929_v0, 1  ;;  %v3933_v5 = vunpack.c.l.bf16 %v2925_v50  ;;  %v364_v29 = vsel %vm334_vm0, %v361_v47, %v363_v21  ;;  %v2953_v0 = vunpack.c.l.bf16 %v2361_v23 }
  0x39   : > { %3961 = vst [vmem:[#allocation6_spill] sm:$0xff] %v2931_v52  ;;  %v405_v44 = vrot.slane %v2931_v52, 1  ;;  %v406_v19 = vrot.slane %v2933_v59, 1  ;;  %v2955_v18 = vunpack.c.h.bf16 %v2361_v23  ;;  %v402_v10 = vsel %vm334_vm0, %v400_v58, %v401_v57 }
  0x3a   : > { %3962 = vst [vmem:[#allocation7_spill] sm:$0xff] %v2933_v59  ;;  %v408_v36 = vrot.slane %v3933_v5, 1  ;;  %v404_v60 = vsel %vm334_vm0, %v401_v57, %v403_v37 }
  0x3b   : > { %2485 = vrot.lane.b32.xlu1 %v2484_v28, %s2604_s28  ;;  %v362_v28 = vsel %vm334_vm0, %v360_v42, %v361_v47  ;;  %3964 = vst [vmem:[#allocation9_spill] sm:$0xff] %v2955_v18  ;;  %v3936_v42 = vunpack.c.l.bf16 %v2944_v40  ;;  %v2489_v50 = vpack.i.bf16 %v404_v60, %v402_v10  ;;  %v366_v23 = vrot.slane %v2955_v18, 1  ;;  %v217_v10 = vld [vmem:[%s2682_s27 + $0xb4] sm:$0xff]   ;;  %v2974_v60 = vld [vmem:[%s2682_s27 + $0xbc] sm:$0x1] }
  0x3c   : > { %2480 = vrot.lane.b32.xlu0 %v2479_v15, %s2604_s28  ;;  %v407_v15 = vsel %vm334_vm0, %v405_v44, %v406_v19  ;;  %v409_v47 = vsel %vm334_vm0, %v406_v19, %v408_v36  ;;  %v2494_v21 = vpack.i.bf16 %v364_v29, %v362_v28  ;;  %3965 = vst [vmem:[#allocation10_spill] sm:$0xff] %v2974_v60  ;;  %v2976_v19 = vunpack.c.l.bf16 %v217_v10  ;;  %v2309_v29 = vld [vmem:[%s3918_s1 + $0xb8] sm:$0xff] }
  0x3d   : > { %2475 = vrot.lane.b32.xlu2 %v2474_v56, %s2604_s28  ;;  %v2499_v5 = vpack.i.bf16 %v409_v47, %v407_v15  ;;  %v365_v56 = vrot.slane %v2953_v0, 1  ;;  %v368_v44 = vrot.slane %v3936_v42, 1  ;;  %v2978_v28 = vunpack.c.h.bf16 %v217_v10  ;;  %v2289_v36 = vld [vmem:[%s3918_s1 + $0x18] sm:$0xff]  ;;  %v2994_v47 = vld [vmem:[%s3918_s1 + $0x48] sm:$0xff]  ;;  %2367 = vmatpush.bf16.msra.mxu1 %v2309_v29 }
  0x3e   : > { %3966 = vst [vmem:[#allocation11_spill] sm:$0xff] %v2976_v19  ;;  %v410_v15 = vrot.slane %v2976_v19, 1  ;;  %1312 = vmatpush.bf16.msra.mxu2 %v2289_v36  ;;  %2373 = vmatpush.bf16.msra.mxu3 %v2994_v47  ;;  %v2307_v36 = vld [vmem:[%s3918_s1 + $0xa8] sm:$0xff] }
  0x3f   : > { %v367_v37 = vsel %vm334_vm0, %v365_v56, %v366_v23  ;;  %v369_v58 = vsel %vm334_vm0, %v366_v23, %v368_v44  ;;  %3967 = vst [vmem:[#allocation12_spill] sm:$0xff] %v2978_v28 }
  0x40   : > { %v2504_v57 = vpack.i.bf16 %v369_v58, %v367_v37  ;;  %v2298_v37 = vld [vmem:[%s3918_s1 + $0x60] sm:$0xff]  ;;  %v2308_v58 = vld [vmem:[%s3918_s1 + $0xb0] sm:$0xff] }
  0x41   : > { %2368 = vmatpush.bf16.msra.mxu1 %v2308_v58 }
  0x43   : > { %2500 = vrot.lane.b32.xlu1 %v2499_v5, %s2604_s28  ;;  %v3935_v5 = vunpack.c.l.bf16 %v2974_v60 }
  0x44   : > { %2495 = vrot.lane.b32.xlu0 %v2494_v21, %s2604_s28  ;;  %v411_v21 = vrot.slane %v2978_v28, 1 }
  0x45   : > { %2490 = vrot.lane.b32.xlu2 %v2489_v50, %s2604_s28  ;;  %v2299_v50 = vld [vmem:[%s3918_s1 + $0x68] sm:$0xff]  ;;  %v413_v56 = vrot.slane %v3935_v5, 1  ;;  %2369 = vmatpush.bf16.msra.mxu1 %v2307_v36 }
  0x46   : > { %1052 = vmatpush.bf16.msra.mxu0 %v2299_v50  ;;  %v412_v23 = vsel %vm334_vm0, %v410_v15, %v411_v21  ;;  %v2294_v50 = vld [vmem:[%s3918_s1 + $0x40] sm:$0xff]  ;;  %v2287_v15 = vld [vmem:[%s3918_s1 + $0x8] sm:$0xff] }
  0x47   : > { %v414_v44 = vsel %vm334_vm0, %v411_v21, %v413_v56  ;;  %2374 = vmatpush.bf16.msra.mxu3 %v2294_v50  ;;  %v2321_v21 = vld [vmem:[%s3918_s1 + $0x118] sm:$0xff]  ;;  %v2306_v56 = vld [vmem:[%s3918_s1 + $0xa0] sm:$0xff] }
  0x48   : > { %v2509_v10 = vpack.i.bf16 %v414_v44, %v412_v23  ;;  %v2286_v23 = vld [vmem:[%s3918_s1] sm:$0xff]  ;;  %v539_v44 = vrot.slane %v2766_v53, 2 }
  0x49   : > { %2370 = vmatpush.bf16.msra.mxu1 %v2306_v56 }
  0x4a   : > { %1053 = vmatpush.bf16.msra.mxu0 %v2298_v37  ;;  %v540_v37 = vrot.slane %v2768_v54, 2 }
  0x4b   : > { %1688 = vmatpush.bf16.msrb.mxu3 %v2321_v21 }
  0x4c   : > { %2510 = vrot.lane.b32.xlu0 %v2509_v10, %s2604_s28  ;;  %v2366_v10 = vld [vmem:[%s2682_s27 + $0xc0] sm:$0xff]  }
  0x4d   : > { %2505 = vrot.lane.b32.xlu2 %v2504_v57, %s2604_s28  ;;  %v2288_v57 = vld [vmem:[%s3918_s1 + $0x10] sm:$0xff]  ;;  %v3038_v5 = vunpack.c.l.bf16 %v2366_v10  ;;  %v3040_v42 = vunpack.c.h.bf16 %v2366_v10 }
  0x4e   : > { %1313 = vmatpush.bf16.msra.mxu2 %v2288_v57  ;;  %1139 = vmatpush.bf16.msrb.mxu0 %v2309_v29  ;;  %v3968_v29 = vunpack.c.l.bf16 %v2753_v45 }
  0x4f   : > { %3970 = vst [vmem:[#allocation14_spill] sm:$0xff] %v3038_v5  ;;  %v416_v28 = vrot.slane %v3040_v42, 1 }
  0x50   : > { %v542_v57 = vrot.slane %v3968_v29, 2  ;;  %3971 = vst [vmem:[#allocation15_spill] sm:$0xff] %v3040_v42  ;;  %v541_v29 = vsel %vm533_vm1, %v539_v44, %v540_v37 }
  0x52   : > { %1314 = vmatpush.bf16.msra.mxu2 %v2287_v15  ;;  %1140 = vmatpush.bf16.msrb.mxu0 %v2308_v58  ;;  %v3036_v15 = vld [vmem:[%s2682_s27 + $0xc8] sm:$0x1]  ;;  %v415_v58 = vrot.slane %v3038_v5, 1  ;;  %v543_v10 = vsel %vm533_vm1, %v540_v37, %v542_v57  ;;  %v2317_v37 = vld [vmem:[%s3918_s1 + $0xf8] sm:$0xff] }
  0x53   : > { %3969 = vst [vmem:[#allocation13_spill] sm:$0xff] %v3036_v15  ;;  %v3949_v60 = vunpack.c.l.bf16 %v3036_v15  ;;  %1595 = vmatpush.bf16.msrb.mxu1 %v2317_v37  ;;  %v534_v37 = vrot.slane %v2735_v34, 2 }
  0x55   : > { %v418_v45 = vrot.slane %v3949_v60, 1 }
  0x56   : > { %1315 = vmatpush.bf16.msra.mxu2 %v2286_v23  ;;  %1141 = vmatpush.bf16.msrb.mxu0 %v2307_v36  ;;  %v417_v23 = vsel %vm334_vm0, %v415_v58, %v416_v28 }
  0x57   : > { %v419_v5 = vsel %vm334_vm0, %v416_v28, %v418_v45 }
  0x58   : > { %v2514_v52 = vpack.i.bf16 %v419_v5, %v417_v23 }
  0x5a   : > { %1401 = vmatpush.bf16.msrb.mxu2 %v2864_v27  ;;  %1142 = vmatpush.bf16.msrb.mxu0 %v2306_v56  ;;  %v570_v56 = vrot.slane %v2700_v9, 2 }
  0x5b   : > { %2515 = vrot.lane.b32.xlu1 %v2514_v52, %s2604_s28  ;;  %v3974_v52 = vunpack.c.l.bf16 %v2686_v1  ;;  %v3975_v1 = vunpack.c.l.bf16 %v2708_v13 }
  0x5e   : > { %1402 = vmatpush.bf16.msrb.mxu2 %v2892_v16  ;;  %v3973_v16 = vunpack.c.l.bf16 %v2695_v6 }
  0x62   : > { %1403 = vmatpush.bf16.msrb.mxu2 %v2994_v47  ;;  %v579_v47 = vrot.slane %v2689_v3, 2 }
  0x66   : > { %1404 = vmatpush.bf16.msrb.mxu2 %v2294_v50  ;;  %v575_v50 = vrot.slane %v2705_v12, 2 }
  0x87   : > { %v2456_v21 = vpop.permute.xlu2 %2455 }
  0x88   : > { %v2458_v19 = vunpack.i.h.bf16 %v2456_v21  ;;  %v2457_v59 = vunpack.i.l.bf16 %v2456_v21  ;;  %v580_v21 = vrot.slane %v2691_v4, 2 }
  0x8a   : > { %v664_v15 = vsel %vm660_vm2, %v2768_v54, %v2458_v19  ;;  %v663_v27 = vsel %vm660_vm2, %v2766_v53, %v2457_v59  ;;  %v572_v59 = vrot.slane %v3973_v16, 2  ;;  %v569_v19 = vrot.slane %v2697_v7, 2 }
  0x8b   : > { %v699_v36 = vpack.c.bf16 %v541_v29, %v663_v27  ;;  %v700_v44 = vpack.c.bf16 %v543_v10, %v664_v15  ;;  %v582_v15 = vrot.slane %v3974_v52, 2  ;;  %v3976_v16 = vunpack.c.l.bf16 %v2724_v25 }
  0x8c   : > { %v571_v29 = vsel %vm533_vm1, %v569_v19, %v570_v56  ;;  %v573_v6 = vsel %vm533_vm1, %v570_v56, %v572_v59  ;;  %v581_v56 = vsel %vm533_vm1, %v579_v47, %v580_v21  ;;  %v545_v25 = vrot.slane %v2744_v39, 2 }
  0x8d   : > { %v814_v57 = vunpack.c.l.b16 %v699_v36  ;;  %v815_v28 = vunpack.c.h.b16 %v699_v36  ;;  %v816_v5 = vunpack.c.l.b16 %v700_v44  ;;  %v817_v58 = vunpack.c.h.b16 %v700_v44 }
  0x8e   : > { %v574_v36 = vrot.slane %v2703_v11, 2  ;;  %v577_v44 = vrot.slane %v3975_v1, 2  ;;  %v537_v59 = vrot.slane %v3976_v16, 2  ;;  %v583_v52 = vsel %vm533_vm1, %v580_v21, %v582_v15 }
  0x8f   : > { %v3062_v54 = vpack.c.b16 %v816_v5, %v814_v57  ;;  %v3064_v53 = vpack.c.b16 %v817_v58, %v815_v28  ;;  %v535_v57 = vrot.slane %v2737_v35, 2  ;;  %v2316_v28 = vld [vmem:[%s3918_s1 + $0xf0] sm:$0xff]  ;;  %v2461_v16 = vpop.permute.xlu2 %2460 }
  0x90   : > { %1596 = vmatpush.bf16.msrb.mxu1 %v2316_v28  ;;  %v578_v1 = vsel %vm533_vm1, %v575_v50, %v577_v44  ;;  %v2463_v18 = vunpack.i.h.bf16 %v2461_v16 }
  0x91   : > { %3972 = vst [vmem:[#allocation16_spill] sm:$0xff] %v3064_v53  ;;  %1054 = vmatmul.bf16.vlgmr.msra.gmra.mxu0 %v3062_v54  ;;  %v538_v47 = vsel %vm533_vm1, %v535_v57, %v537_v59  ;;  %v2320_v59 = vld [vmem:[%s3918_s1 + $0x110] sm:$0xff] }
  0x92   : > { %1689 = vmatpush.bf16.msrb.mxu3 %v2320_v59 }
  0x95   : > { %v3073_v45 = vpop.permute.xlu1 %2445 }
  0x96   : > { %v2436_v10 = vpop.permute.xlu0 %2435  ;;  %v2448_v15 = vunpack.i.h.bf16 %v3073_v45 }
  0x97   : > { %v2438_v23 = vunpack.i.h.bf16 %v2436_v10  ;;  %v2437_v27 = vunpack.i.l.bf16 %v2436_v10  ;;  %v576_v10 = vsel %vm533_vm1, %v574_v36, %v575_v50 }
  0x99   : > { %v676_v5 = vsel %vm660_vm2, %v2700_v9, %v2438_v23  ;;  %v675_v58 = vsel %vm660_vm2, %v2697_v7, %v2437_v27  ;;  %v536_v9 = vsel %vm533_vm1, %v534_v37, %v535_v57  ;;  %v544_v7 = vrot.slane %v2742_v38, 2 }
  0x9a   : > { %v712_v19 = vpack.c.bf16 %v573_v6, %v676_v5  ;;  %v711_v13 = vpack.c.bf16 %v571_v29, %v675_v58  ;;  %v3977_v29 = vunpack.c.l.bf16 %v2731_v31  ;;  %v584_v37 = vrot.slane %v2803_v22, 2 }
  0x9b   : > { %v585_v5 = vrot.slane %v2805_v24, 2  ;;  %v2447_v58 = vunpack.i.l.bf16 %v3073_v45 }
  0x9c   : > { %v839_v60 = vunpack.c.h.b16 %v711_v13  ;;  %v841_v53 = vunpack.c.h.b16 %v712_v19  ;;  %v547_v6 = vrot.slane %v3977_v29, 2 }
  0x9d   : > { %v2451_v23 = vpop.permute.xlu1 %2450  ;;  %v679_v40 = vsel %vm660_vm2, %v2689_v3, %v2447_v58  ;;  %v3980_v58 = vunpack.c.l.bf16 %v2849_v8 }
  0x9e   : > { %v2441_v21 = vpop.permute.xlu0 %2440  ;;  %v2453_v27 = vunpack.i.h.bf16 %v2451_v23  ;;  %v2452_v36 = vunpack.i.l.bf16 %v2451_v23  ;;  %v3105_v50 = vpack.c.b16 %v841_v53, %v839_v60  ;;  %v3979_v60 = vunpack.c.l.bf16 %v2790_v14 }
  0x9f   : > { %v2443_v44 = vunpack.i.h.bf16 %v2441_v21  ;;  %v2442_v28 = vunpack.i.l.bf16 %v2441_v21  ;;  %v838_v14 = vunpack.c.l.b16 %v711_v13  ;;  %v548_v13 = vsel %vm533_vm1, %v545_v25, %v547_v6 }
  0xa0   : > { %3978 = vst [vmem:[#allocation17_spill] sm:$0xff] %v3105_v50  ;;  %v662_v31 = vsel %vm660_vm2, %v2737_v35, %v2453_v27  ;;  %v661_v57 = vsel %vm660_vm2, %v2735_v34, %v2452_v36  ;;  %2184 = vmatmul.msk.bf16.vlgmr.msra.gmra.mxu3 %vm660_vm2, %v3105_v50  ;;  %v587_v53 = vrot.slane %v3979_v60, 2  ;;  %v680_v34 = vsel %vm660_vm2, %v2691_v4, %v2448_v15 }
  0xa1   : > { %v678_v45 = vsel %vm660_vm2, %v2705_v12, %v2443_v44  ;;  %v677_v35 = vsel %vm660_vm2, %v2703_v11, %v2442_v28  ;;  %v697_v23 = vpack.c.bf16 %v536_v9, %v661_v57  ;;  %v698_v29 = vpack.c.bf16 %v538_v47, %v662_v31 }
  0xa2   : > { %v714_v21 = vpack.c.bf16 %v578_v1, %v678_v45  ;;  %v713_v27 = vpack.c.bf16 %v576_v10, %v677_v35  ;;  %v2462_v47 = vunpack.i.l.bf16 %v2461_v16  ;;  %v840_v28 = vunpack.c.l.b16 %v712_v19  ;;  %v2476_v16 = vpop.permute.xlu2 %2475 }
  0xa3   : > { %v1226_v36 = vunpack.c.l.b16 %v697_v23  ;;  %v1227_v60 = vunpack.c.h.b16 %v697_v23  ;;  %v1228_v50 = vunpack.c.l.b16 %v698_v29  ;;  %v1229_v42 = vunpack.c.h.b16 %v698_v29 }
  0xa4   : > { %v843_v12 = vunpack.c.h.b16 %v713_v27  ;;  %v845_v44 = vunpack.c.h.b16 %v714_v21  ;;  %v716_v4 = vpack.c.bf16 %v583_v52, %v680_v34  ;;  %v546_v10 = vsel %vm533_vm1, %v544_v7, %v545_v25  ;;  %v2315_v7 = vld [vmem:[%s3918_s1 + $0xe8] sm:$0xff] }
  0xa5   : > { %v1230_v11 = vpack.c.b16 %v1228_v50, %v1226_v36  ;;  %v3129_v9 = vpack.c.b16 %v1229_v42, %v1227_v60  ;;  %v715_v31 = vpack.c.bf16 %v581_v56, %v679_v40  ;;  %v3135_v3 = vpack.c.b16 %v840_v28, %v838_v14  ;;  %1597 = vmatpush.bf16.msrb.mxu1 %v2315_v7 }
  0xa6   : > { %v2466_v1 = vpop.permute.xlu0 %2465  ;;  %v3133_v15 = vpack.c.b16 %v845_v44, %v843_v12  ;;  %v586_v42 = vsel %vm533_vm1, %v584_v37, %v585_v5  ;;  %v588_v19 = vsel %vm533_vm1, %v585_v5, %v587_v53  ;;  %v549_v52 = vrot.slane %v2859_v26, 2  ;;  %v2471_v12 = vpop.permute.xlu1 %2470 }
  0xa7   : > { %v2468_v57 = vunpack.i.h.bf16 %v2466_v1  ;;  %v2467_v59 = vunpack.i.l.bf16 %v2466_v1  ;;  %1316 = vmatmul.bf16.vlgmr.msra.gmra.mxu2 %v1230_v11  ;;  %v682_v25 = vsel %vm660_vm2, %v2805_v24, %v2463_v18  ;;  %v681_v6 = vsel %vm660_vm2, %v2803_v22, %v2462_v47 }
  0xa8   : > { %2120 = vmatmul.msk.bf16.vlgmr.msra.gmra.mxu1 %vm660_vm2, %v3133_v15  ;;  %v550_v5 = vrot.slane %v2868_v33, 2  ;;  %v552_v53 = vrot.slane %v3980_v58, 2  ;;  %v842_v45 = vunpack.c.l.b16 %v713_v27  ;;  %v846_v35 = vunpack.c.l.b16 %v715_v31  ;;  %v2314_v58 = vld [vmem:[%s3918_s1 + $0xe0] sm:$0xff] }
  0xa9   : > { %v666_v40 = vsel %vm660_vm2, %v2744_v39, %v2468_v57  ;;  %v665_v56 = vsel %vm660_vm2, %v2742_v38, %v2467_v59  ;;  %v844_v39 = vunpack.c.l.b16 %v714_v21  ;;  %v848_v23 = vunpack.c.l.b16 %v716_v4  ;;  %1598 = vmatpush.bf16.msrb.mxu1 %v2314_v58 }
  0xaa   : > { %v702_v50 = vpack.c.bf16 %v548_v13, %v666_v40  ;;  %v701_v37 = vpack.c.bf16 %v546_v10, %v665_v56  ;;  %v3156_v38 = vpack.c.bf16 %v588_v19, %v682_v25  ;;  %v3158_v29 = vpack.c.bf16 %v586_v42, %v681_v6 }
  0xab   : > { %v2478_v22 = vunpack.i.h.bf16 %v2476_v16  ;;  %v2477_v34 = vunpack.i.l.bf16 %v2476_v16  ;;  %v3160_v14 = vpack.c.b16 %v844_v39, %v842_v45  ;;  %v3162_v36 = vpack.c.b16 %v848_v23, %v846_v35 }
  0xac   : > { %v818_v18 = vunpack.c.l.b16 %v701_v37  ;;  %v820_v24 = vunpack.c.l.b16 %v702_v50  ;;  %v551_v60 = vsel %vm533_vm1, %v549_v52, %v550_v5  ;;  %v847_v21 = vunpack.c.h.b16 %v715_v31 }
  0xad   : > { %v849_v27 = vunpack.c.h.b16 %v716_v4  ;;  %v850_v44 = vunpack.c.l.b16 %v3158_v29  ;;  %v852_v11 = vunpack.c.l.b16 %v3156_v38  ;;  %v553_v47 = vsel %vm533_vm1, %v550_v5, %v552_v53 }
  0xae   : > { %v3164_v8 = vpack.c.b16 %v820_v24, %v818_v18  ;;  %v668_v28 = vsel %vm660_vm2, %v2868_v33, %v2478_v22  ;;  %v667_v10 = vsel %vm660_vm2, %v2859_v26, %v2477_v34  ;;  %v589_v13 = vrot.slane %v2781_v61, 2 }
  0xaf   : > { %v590_v1 = vrot.slane %v2797_v17, 2  ;;  %v3981_v31 = vunpack.c.l.bf16 %v2771_v55  ;;  %v2473_v57 = vunpack.i.h.bf16 %v2471_v12  ;;  %v2472_v59 = vunpack.i.l.bf16 %v2471_v12 }
  0xb0   : > { %1059 = vmatmul.bf16.gmra.mxu0 %v3164_v8  ;;  %2185 = vmatmul.msk.bf16.gmra.mxu3 %vm660_vm2, %v3133_v15  ;;  %v704_v42 = vpack.c.bf16 %v553_v47, %v668_v28  ;;  %v703_v19 = vpack.c.bf16 %v551_v60, %v667_v10  ;;  %v3181_v52 = vpack.c.b16 %v849_v27, %v847_v21  ;;  %v821_v55 = vunpack.c.h.b16 %v702_v50  ;;  %v2481_v21 = vpop.permute.xlu0 %2480 }
  0xb1   : > { %v592_v4 = vrot.slane %v3981_v31, 2  ;;  %v3183_v7 = vpack.c.b16 %v852_v11, %v850_v44  ;;  %v591_v33 = vsel %vm533_vm1, %v589_v13, %v590_v1  ;;  %v684_v26 = vsel %vm660_vm2, %v2797_v17, %v2473_v57  ;;  %v2486_v17 = vpop.permute.xlu1 %2485 }
  0xb2   : > { %v683_v56 = vsel %vm660_vm2, %v2781_v61, %v2472_v59  ;;  %v819_v25 = vunpack.c.h.b16 %v701_v37  ;;  %v822_v6 = vunpack.c.l.b16 %v703_v19  ;;  %v824_v5 = vunpack.c.l.b16 %v704_v42 }
  0xb3   : > { %v593_v40 = vsel %vm533_vm1, %v590_v1, %v592_v4  ;;  %v3199_v16 = vpack.c.bf16 %v591_v33, %v683_v56  ;;  %v555_v37 = vrot.slane %v2829_v48, 2  ;;  %v3982_v45 = vunpack.c.l.bf16 %v2817_v32  ;;  %v2319_v33 = vld [vmem:[%s3918_s1 + $0x108] sm:$0xff] }
  0xb4   : > { %v3197_v53 = vpack.c.bf16 %v593_v40, %v684_v26  ;;  %v3201_v61 = vpack.c.b16 %v821_v55, %v819_v25  ;;  %v3203_v50 = vpack.c.b16 %v824_v5, %v822_v6  ;;  %v2488_v35 = vunpack.i.h.bf16 %v2486_v17  ;;  %1690 = vmatpush.bf16.msrb.mxu3 %v2319_v33 }
  0xb5   : > { %v557_v39 = vrot.slane %v3982_v45, 2  ;;  %v2487_v23 = vunpack.i.l.bf16 %v2486_v17  ;;  %v854_v18 = vunpack.c.l.b16 %v3199_v16  ;;  %v851_v60 = vunpack.c.h.b16 %v3158_v29 }
  0xb6   : > { %v856_v24 = vunpack.c.l.b16 %v3197_v53  ;;  %v853_v32 = vunpack.c.h.b16 %v3156_v38  ;;  %v670_v12 = vsel %vm660_vm2, %v2829_v48, %v2488_v35  ;;  %v594_v11 = vrot.slane %v2844_v63, 2 }
  0xb7   : > { %1321 = vmatmul.bf16.gmra.mxu2 %v3062_v54  ;;  %v554_v54 = vrot.slane %v2822_v41, 2  ;;  %v558_v27 = vsel %vm533_vm1, %v555_v37, %v557_v39  ;;  %v669_v44 = vsel %vm660_vm2, %v2822_v41, %v2487_v23  ;;  %v595_v47 = vrot.slane %v2846_v2, 2  ;;  %v2491_v23 = vpop.permute.xlu2 %2490 }
  0xb8   : > { %2121 = vmatmul.msk.bf16.gmra.mxu1 %vm660_vm2, %v3181_v52  ;;  %v3211_v22 = vpack.c.b16 %v856_v24, %v854_v18  ;;  %v3983_v28 = vunpack.c.l.bf16 %v2832_v49  ;;  %v2483_v13 = vunpack.i.h.bf16 %v2481_v21  ;;  %v2482_v29 = vunpack.i.l.bf16 %v2481_v21  ;;  %v2496_v55 = vpop.permute.xlu0 %2495  ;;  %v2313_v18 = vld [vmem:[%s3918_s1 + $0xd8] sm:$0xff] }
  0xb9   : > { %v556_v34 = vsel %vm533_vm1, %v554_v54, %v555_v37  ;;  %v706_v1 = vpack.c.bf16 %v558_v27, %v670_v12  ;;  %v3228_v31 = vpack.c.b16 %v853_v32, %v851_v60  ;;  %v596_v4 = vsel %vm533_vm1, %v594_v11, %v595_v47  ;;  %1599 = vmatpush.bf16.msrb.mxu1 %v2313_v18 }
  0xba   : > { %v597_v10 = vrot.slane %v3983_v28, 2  ;;  %v705_v38 = vpack.c.bf16 %v556_v34, %v669_v44  ;;  %v686_v41 = vsel %vm660_vm2, %v2846_v2, %v2483_v13  ;;  %v685_v57 = vsel %vm660_vm2, %v2844_v63, %v2482_v29 }
  0xbb   : > { %v828_v59 = vunpack.c.l.b16 %v706_v1  ;;  %v3244_v26 = vpack.c.bf16 %v596_v4, %v685_v57  ;;  %v823_v56 = vunpack.c.h.b16 %v703_v19  ;;  %v825_v2 = vunpack.c.h.b16 %v704_v42 }
  0xbc   : > { %v598_v48 = vsel %vm533_vm1, %v595_v47, %v597_v10  ;;  %v826_v49 = vunpack.c.l.b16 %v705_v38  ;;  %v559_v6 = vrot.slane %v2903_v62, 2  ;;  %v560_v5 = vrot.slane %v2905_v20, 2 }
  0xbd   : > { %v3242_v40 = vpack.c.bf16 %v598_v48, %v686_v41  ;;  %v3246_v63 = vpack.c.b16 %v825_v2, %v823_v56  ;;  %v3984_v58 = vunpack.c.l.bf16 %v2879_v46  ;;  %v2498_v54 = vunpack.i.h.bf16 %v2496_v55  ;;  %v3987_v56 = vld [vmem:[#allocation8_spill] sm:$0xff] }
  0xbe   : > { %v3248_v25 = vpack.c.b16 %v828_v59, %v826_v49  ;;  %v2497_v37 = vunpack.i.l.bf16 %v2496_v55  ;;  %v858_v45 = vunpack.c.l.b16 %v3244_v26  ;;  %v561_v39 = vsel %vm533_vm1, %v559_v6, %v560_v5  ;;  %v3986_v59 = vld [vmem:[#allocation9_spill] sm:$0xff] }
  0xbf   : > { %v562_v17 = vrot.slane %v3984_v58, 2  ;;  %v860_v19 = vunpack.c.l.b16 %v3242_v40  ;;  %v855_v35 = vunpack.c.h.b16 %v3199_v16  ;;  %v857_v46 = vunpack.c.h.b16 %v3197_v53  ;;  %v2506_v57 = vpop.permute.xlu2 %2505 }
  0xc0   : > { %1064 = vmatmul.bf16.gmra.mxu0 %v3203_v50  ;;  %2186 = vmatmul.msk.bf16.gmra.mxu3 %vm660_vm2, %v3181_v52  ;;  %v672_v34 = vsel %vm660_vm2, %v2905_v20, %v2498_v54  ;;  %v671_v60 = vsel %vm660_vm2, %v2903_v62, %v2497_v37  ;;  %v599_v32 = vrot.slane %v2917_v43, 2  ;;  %v600_v21 = vrot.slane %v2919_v30, 2 }
  0xc1   : > { %v3256_v42 = vpack.c.b16 %v860_v19, %v858_v45  ;;  %v563_v24 = vsel %vm533_vm1, %v560_v5, %v562_v17  ;;  %v3985_v16 = vunpack.c.l.bf16 %v2900_v51  ;;  %v2493_v27 = vunpack.i.h.bf16 %v2491_v23  ;;  %v2312_v19 = vld [vmem:[%s3918_s1 + $0xd0] sm:$0xff] }
  0xc2   : > { %v2492_v12 = vunpack.i.l.bf16 %v2491_v23  ;;  %v708_v44 = vpack.c.bf16 %v563_v24, %v672_v34  ;;  %v707_v11 = vpack.c.bf16 %v561_v39, %v671_v60  ;;  %v3276_v47 = vpack.c.b16 %v857_v46, %v855_v35  ;;  %v3989_v23 = vld [vmem:[#allocation6_spill] sm:$0xff]  ;;  %v3990_v24 = vld [vmem:[#allocation7_spill] sm:$0xff]  ;;  %v3991_v60 = vld [vmem:[#allocation5_spill] sm:$0xff]  ;;  %1600 = vmatpush.bf16.msrb.mxu1 %v2312_v19 }
  0xc3   : > { %v602_v53 = vrot.slane %v3985_v16, 2  ;;  %v601_v28 = vsel %vm533_vm1, %v599_v32, %v600_v21  ;;  %v688_v62 = vsel %vm660_vm2, %v2919_v30, %v2493_v27  ;;  %v827_v48 = vunpack.c.h.b16 %v705_v38  ;;  %v2501_v38 = vpop.permute.xlu1 %2500 }
  0xc4   : > { %v687_v10 = vsel %vm660_vm2, %v2917_v43, %v2492_v12  ;;  %v830_v51 = vunpack.c.l.b16 %v707_v11  ;;  %v832_v13 = vunpack.c.l.b16 %v708_v44  ;;  %v829_v41 = vunpack.c.h.b16 %v706_v1 }
  0xc5   : > { %v603_v20 = vsel %vm533_vm1, %v600_v21, %v602_v53  ;;  %v3289_v4 = vpack.c.bf16 %v601_v28, %v687_v10  ;;  %v564_v43 = vrot.slane %v2953_v0, 2  ;;  %v565_v33 = vrot.slane %v3986_v59, 2 }
  0xc6   : > { %v3287_v29 = vpack.c.bf16 %v603_v20, %v688_v62  ;;  %v3291_v49 = vpack.c.b16 %v829_v41, %v827_v48  ;;  %v3293_v30 = vpack.c.b16 %v832_v13, %v830_v51  ;;  %v3988_v2 = vunpack.c.l.bf16 %v3987_v56  ;;  %v2318_v48 = vld [vmem:[%s3918_s1 + $0x100] sm:$0xff] }
  0xc7   : > { %1326 = vmatmul.bf16.gmra.mxu2 %v3164_v8  ;;  %v2508_v6 = vunpack.i.h.bf16 %v2506_v57  ;;  %v2507_v5 = vunpack.i.l.bf16 %v2506_v57  ;;  %v862_v58 = vunpack.c.l.b16 %v3289_v4  ;;  %v566_v54 = vsel %vm533_vm1, %v564_v43, %v565_v33  ;;  %1691 = vmatpush.bf16.msrb.mxu3 %v2318_v48 }
  0xc8   : > { %2122 = vmatmul.msk.bf16.gmra.mxu1 %vm660_vm2, %v3228_v31  ;;  %v567_v55 = vrot.slane %v3988_v2, 2  ;;  %v864_v17 = vunpack.c.l.b16 %v3287_v29  ;;  %v859_v37 = vunpack.c.h.b16 %v3244_v26  ;;  %v861_v45 = vunpack.c.h.b16 %v3242_v40 }
  0xc9   : > { %v674_v35 = vsel %vm660_vm2, %v3986_v59, %v2508_v6  ;;  %v673_v46 = vsel %vm660_vm2, %v2953_v0, %v2507_v5  ;;  %v604_v18 = vrot.slane %v3989_v23, 2  ;;  %v605_v34 = vrot.slane %v3990_v24, 2  ;;  %v2311_v6 = vld [vmem:[%s3918_s1 + $0xc8] sm:$0xff]  ;;  %v3993_v5 = vld [vmem:[#allocation11_spill] sm:$0xff] }
  0xca   : > { %v3301_v1 = vpack.c.b16 %v864_v17, %v862_v58  ;;  %v568_v39 = vsel %vm533_vm1, %v565_v33, %v567_v55  ;;  %v3992_v26 = vunpack.c.l.bf16 %v3991_v60  ;;  %v2503_v40 = vunpack.i.h.bf16 %v2501_v38  ;;  %v2511_v33 = vpop.permute.xlu0 %2510  ;;  %v3994_v17 = vld [vmem:[#allocation12_spill] sm:$0xff]  ;;  %1601 = vmatpush.bf16.msrb.mxu1 %v2311_v6 }
  0xcb   : > { %v2502_v21 = vunpack.i.l.bf16 %v2501_v38  ;;  %v710_v16 = vpack.c.bf16 %v568_v39, %v674_v35  ;;  %v709_v53 = vpack.c.bf16 %v566_v54, %v673_v46  ;;  %v3321_v27 = vpack.c.b16 %v861_v45, %v859_v37  ;;  %v3995_v54 = vld [vmem:[#allocation10_spill] sm:$0xff] }
  0xcc   : > { %v607_v32 = vrot.slane %v3992_v26, 2  ;;  %v606_v12 = vsel %vm533_vm1, %v604_v18, %v605_v34  ;;  %v690_v0 = vsel %vm660_vm2, %v3990_v24, %v2503_v40  ;;  %v833_v62 = vunpack.c.h.b16 %v708_v44 }
  0xcd   : > { %v689_v20 = vsel %vm660_vm2, %v3989_v23, %v2502_v21  ;;  %v831_v10 = vunpack.c.h.b16 %v707_v11  ;;  %v834_v51 = vunpack.c.l.b16 %v709_v53  ;;  %v836_v13 = vunpack.c.l.b16 %v710_v16  ;;  %v2516_v21 = vpop.permute.xlu1 %2515 }
  0xce   : > { %v608_v28 = vsel %vm533_vm1, %v605_v34, %v607_v32  ;;  %v725_v57 = vpack.c.bf16 %v606_v12, %v689_v20  ;;  %v863_v2 = vunpack.c.h.b16 %v3289_v4  ;;  %v865_v55 = vunpack.c.h.b16 %v3287_v29  ;;  %v3998_v20 = vld [vmem:[#allocation15_spill] sm:$0xff] }
  0xcf   : > { %v726_v41 = vpack.c.bf16 %v608_v28, %v690_v0  ;;  %v3335_v43 = vpack.c.b16 %v833_v62, %v831_v10  ;;  %v3337_v59 = vpack.c.b16 %v836_v13, %v834_v51  ;;  %v609_v58 = vrot.slane %v3993_v5, 2  ;;  %v3997_v28 = vld [vmem:[#allocation14_spill] sm:$0xff]  ;;  %v3999_v10 = vld [vmem:[#allocation13_spill] sm:$0xff] }
  0xd0   : > { %1069 = vmatmul.bf16.gmra.mxu0 %v3248_v25  ;;  %2187 = vmatmul.msk.bf16.gmra.mxu3 %vm660_vm2, %v3228_v31  ;;  %v866_v44 = vunpack.c.l.b16 %v725_v57  ;;  %v610_v38 = vrot.slane %v3994_v17, 2  ;;  %v3996_v37 = vunpack.c.l.bf16 %v3995_v54  ;;  %v2513_v19 = vunpack.i.h.bf16 %v2511_v33 }
  0xd1   : > { %v868_v11 = vunpack.c.l.b16 %v726_v41  ;;  %v2512_v39 = vunpack.i.l.bf16 %v2511_v33  ;;  %v3353_v35 = vpack.c.b16 %v865_v55, %v863_v2  ;;  %v837_v18 = vunpack.c.h.b16 %v710_v16  ;;  %v2310_v33 = vld [vmem:[%s3918_s1 + $0xc0] sm:$0xff] }
  0xd2   : > { %v612_v45 = vrot.slane %v3996_v37, 2  ;;  %v611_v4 = vsel %vm533_vm1, %v609_v58, %v610_v38  ;;  %v692_v46 = vsel %vm660_vm2, %v3994_v17, %v2513_v19  ;;  %v835_v24 = vunpack.c.h.b16 %v709_v53  ;;  %1602 = vmatpush.bf16.msrb.mxu1 %v2310_v33 }
  0xd3   : > { %v3339_v56 = vpack.c.b16 %v868_v11, %v866_v44  ;;  %v691_v23 = vsel %vm660_vm2, %v3993_v5, %v2512_v39  ;;  %v867_v16 = vunpack.c.h.b16 %v725_v57  ;;  %v869_v53 = vunpack.c.h.b16 %v726_v41 }
  0xd4   : > { %v613_v29 = vsel %vm533_vm1, %v610_v38, %v612_v45  ;;  %v727_v60 = vpack.c.bf16 %v611_v4, %v691_v23  ;;  %v3364_v26 = vpack.c.b16 %v837_v18, %v835_v24  ;;  %v614_v0 = vrot.slane %v3997_v28, 2 }
  0xd5   : > { %v728_v34 = vpack.c.bf16 %v613_v29, %v692_v46  ;;  %v615_v62 = vrot.slane %v3998_v20, 2  ;;  %v4000_v51 = vunpack.c.l.bf16 %v3999_v10  ;;  %v2518_v48 = vunpack.i.h.bf16 %v2516_v21 }
  0xd6   : > { %v870_v32 = vunpack.c.l.b16 %v727_v60  ;;  %v2517_v44 = vunpack.i.l.bf16 %v2516_v21  ;;  %v3375_v11 = vpack.c.b16 %v869_v53, %v867_v16  ;;  %v871_v54 = vunpack.c.h.b16 %v727_v60 }
  0xd7   : > { %1331 = vmatmul.bf16.gmra.mxu2 %v3203_v50  ;;  %v872_v40 = vunpack.c.l.b16 %v728_v34  ;;  %v617_v13 = vrot.slane %v4000_v51, 2  ;;  %v616_v2 = vsel %vm533_vm1, %v614_v0, %v615_v62  ;;  %v694_v41 = vsel %vm660_vm2, %v3998_v20, %v2518_v48 }
  0xd8   : > { %2123 = vmatmul.msk.bf16.gmra.mxu1 %vm660_vm2, %v3276_v47  ;;  %v693_v55 = vsel %vm660_vm2, %v3997_v28, %v2517_v44  ;;  %v873_v37 = vunpack.c.h.b16 %v728_v34 }
  0xd9   : > { %v3366_v12 = vpack.c.b16 %v872_v40, %v870_v32  ;;  %v618_v57 = vsel %vm533_vm1, %v615_v62, %v617_v13  ;;  %v729_v5 = vpack.c.bf16 %v616_v2, %v693_v55 }
  0xda   : > { %v730_v6 = vpack.c.bf16 %v618_v57, %v694_v41  ;;  %v3394_v45 = vpack.c.b16 %v873_v37, %v871_v54 }
  0xdb   : > { %v874_v58 = vunpack.c.l.b16 %v729_v5  ;;  %v875_v39 = vunpack.c.h.b16 %v729_v5 }
  0xdc   : > { %v876_v17 = vunpack.c.l.b16 %v730_v6  ;;  %v877_v4 = vunpack.c.h.b16 %v730_v6 }
  0xde   : > { %v3389_v38 = vpack.c.b16 %v876_v17, %v874_v58  ;;  %v3408_v23 = vpack.c.b16 %v877_v4, %v875_v39 }
  0xe0   : > { %1074 = vmatmul.bf16.gmra.mxu0 %v3293_v30  ;;  %2188 = vmatmul.msk.bf16.gmra.mxu3 %vm660_vm2, %v3276_v47 }
  0xe7   : > { %1336 = vmatmul.bf16.gmra.mxu2 %v3248_v25 }
  0xe8   : > { %2124 = vmatmul.msk.bf16.gmra.mxu1 %vm660_vm2, %v3321_v27 }
  0xf0   : > { %1079 = vmatmul.bf16.gmra.mxu0 %v3337_v59  ;;  %2189 = vmatmul.msk.bf16.gmra.mxu3 %vm660_vm2, %v3321_v27 }
  0xf7   : > { %1341 = vmatmul.bf16.gmra.mxu2 %v3293_v30 }
  0xf8   : > { %2125 = vmatmul.msk.bf16.gmra.mxu1 %vm660_vm2, %v3353_v35 }
 0x100   : > { %1084 = vmatmul.bf16.gmra.mxu0 %v3135_v3  ;;  %2190 = vmatmul.msk.bf16.gmra.mxu3 %vm660_vm2, %v3353_v35 }
 0x107   : > { %1346 = vmatmul.bf16.gmra.mxu2 %v3337_v59 }
 0x108   : > { %2126 = vmatmul.msk.bf16.gmra.mxu1 %vm660_vm2, %v3375_v11 }
 0x10e   : > { %v3399_v19 = vpop.f32.mrf.mxu0 }
 0x110   : > { %1089 = vmatmul.bf16.gmra.mxu0 %v3160_v14  ;;  %2191 = vmatmul.msk.bf16.gmra.mxu3 %vm660_vm2, %v3375_v11 }
 0x116   : > { %v3406_v46 = vpop.f32.mrf.mxu0 }
 0x117   : > { %1351 = vmatmul.bf16.gmra.mxu2 %v3135_v3 }
 0x118   : > { %2127 = vmatmul.msk.bf16.gmra.mxu1 %vm660_vm2, %v3394_v45 }
 0x120   : > { %1094 = vmatmul.bf16.gmra.mxu0 %v3162_v36  ;;  %2192 = vmatmul.msk.bf16.gmra.mxu3 %vm660_vm2, %v3394_v45 }
 0x123   : > { %v3404_v29 = vpop.f32.mrf.mxu3 }
 0x125   : > { %v3410_v18 = vpop.f32.mrf.mxu1 }
 0x127   : > { %1356 = vmatmul.bf16.gmra.mxu2 %v3160_v14 }
 0x128   : > { %2128 = vmatmul.msk.bf16.gmra.mxu1 %vm660_vm2, %v3408_v23 }
 0x12a   : > { %v3415_v24 = vpop.f32.mrf.mxu2 }
 0x12b   : > { %v3417_v34 = vpop.f32.mrf.mxu3 }
 0x12d   : > { %v3419_v60 = vpop.f32.mrf.mxu0  ;;  %v3421_v32 = vpop.f32.mrf.mxu1 }
 0x130   : > { %1099 = vmatmul.bf16.gmra.mxu0 %v3183_v7  ;;  %2265 = vmatmul.msk.bf16.vlgmr.msrb.gmra.mxu3 %vm660_vm2, %v3201_v61 }
 0x132   : > { %v3426_v40 = vpop.f32.mrf.mxu2 }
 0x133   : > { %v3428_v21 = vpop.f32.mrf.mxu3 }
 0x134   : > { %4001 = vst [vmem:[#allocation9_spill] sm:$0xff] %v3428_v21 }
 0x135   : > { %v3430_v16 = vpop.f32.mrf.mxu0  ;;  %v3432_v53 = vpop.f32.mrf.mxu1 }
 0x136   : > { %4002 = vst [vmem:[#allocation8_spill] sm:$0xff] %v3430_v16 }
 0x137   : > { %1361 = vmatmul.bf16.gmra.mxu2 %v3162_v36 }
 0x138   : > { %1603 = vmatmul.bf16.vlgmr.msrb.gmra.mxu1 %v3164_v8 }
 0x13a   : > { %v3436_v28 = vpop.f32.mrf.mxu2 }
 0x13b   : > { %4003 = vst [vmem:[#allocation6_spill] sm:$0xff] %v3436_v28  ;;  %v3438_v0 = vpop.f32.mrf.mxu3 }
 0x13c   : > { %4004 = vst [vmem:[#allocation7_spill] sm:$0xff] %v3438_v0 }
 0x13d   : > { %v3440_v20 = vpop.f32.mrf.mxu0  ;;  %v3442_v62 = vpop.f32.mrf.mxu1 }
 0x13e   : > { %4005 = vst [vmem:[#allocation5_spill] sm:$0xff] %v3440_v20 }
 0x140   : > { %1104 = vmatmul.bf16.gmra.mxu0 %v3211_v22  ;;  %2266 = vmatmul.msk.bf16.gmra.mxu3 %vm660_vm2, %v3246_v63 }
 0x142   : > { %v3447_v10 = vpop.f32.mrf.mxu2 }
 0x143   : > { %4006 = vst [vmem:[#allocation11_spill] sm:$0xff] %v3447_v10  ;;  %v3449_v51 = vpop.f32.mrf.mxu3 }
 0x144   : > { %4007 = vst [vmem:[#allocation12_spill] sm:$0xff] %v3449_v51 }
 0x145   : > { %v3451_v13 = vpop.f32.mrf.mxu0  ;;  %v3453_v8 = vpop.f32.mrf.mxu1 }
 0x146   : > { %4008 = vst [vmem:[#allocation10_spill] sm:$0xff] %v3451_v13 }
 0x147   : > { %1366 = vmatmul.bf16.gmra.mxu2 %v3183_v7 }
 0x148   : > { %1608 = vmatmul.bf16.gmra.mxu1 %v3203_v50 }
 0x14a   : > { %v3457_v48 = vpop.f32.mrf.mxu2 }
 0x14b   : > { %4009 = vst [vmem:[#allocation14_spill] sm:$0xff] %v3457_v48  ;;  %v3459_v44 = vpop.f32.mrf.mxu3  ;;  %v3567_v48 = vld [vmem:[%s2682_s27 + $0xd4] sm:$0x1] }
 0x14c   : > { %4010 = vst [vmem:[#allocation15_spill] sm:$0xff] %v3459_v44  ;;  %v279_v20 = vunpack.c.l.bf16 %v3567_v48 }
 0x14d   : > { %v3461_v33 = vpop.f32.mrf.mxu0  ;;  %v3463_v2 = vpop.f32.mrf.mxu1 }
 0x14e   : > { %4011 = vst [vmem:[#allocation13_spill] sm:$0xff] %v3461_v33 }
 0x150   : > { %1109 = vmatmul.bf16.gmra.mxu0 %v3256_v42  ;;  %2267 = vmatmul.msk.bf16.gmra.mxu3 %vm660_vm2, %v3291_v49 }
 0x152   : > { %v3468_v57 = vpop.f32.mrf.mxu2 }
 0x153   : > { %4012 = vst [vmem:[#allocation18_spill] sm:$0xff] %v3468_v57  ;;  %v3470_v41 = vpop.f32.mrf.mxu3 }
 0x154   : > { %4013 = vst [vmem:[#allocation19_spill] sm:$0xff] %v3470_v41 }
 0x155   : > { %v3472_v55 = vpop.f32.mrf.mxu0  ;;  %v3474_v50 = vpop.f32.mrf.mxu1 }
 0x156   : > { %4014 = vst [vmem:[#allocation20_spill] sm:$0xff] %v3472_v55 }
 0x157   : > { %1371 = vmatmul.bf16.gmra.mxu2 %v3211_v22 }
 0x158   : > { %1613 = vmatmul.bf16.gmra.mxu1 %v3248_v25 }
 0x15a   : > { %v3478_v6 = vpop.f32.mrf.mxu2 }
 0x15b   : > { %4015 = vst [vmem:[#allocation21_spill] sm:$0xff] %v3478_v6  ;;  %v3480_v5 = vpop.f32.mrf.mxu3 }
 0x15c   : > { %4016 = vst [vmem:[#allocation22_spill] sm:$0xff] %v3480_v5 }
 0x15d   : > { %v3482_v58 = vpop.f32.mrf.mxu0  ;;  %v3484_v17 = vpop.f32.mrf.mxu1 }
 0x15e   : > { %4017 = vst [vmem:[#allocation23_spill] sm:$0xff] %v3482_v58 }
 0x160   : > { %1114 = vmatmul.bf16.gmra.mxu0 %v3301_v1  ;;  %2268 = vmatmul.msk.bf16.gmra.mxu3 %vm660_vm2, %v3335_v43 }
 0x162   : > { %v3489_v54 = vpop.f32.mrf.mxu2 }
 0x163   : > { %4018 = vst [vmem:[#allocation24_spill] sm:$0xff] %v3489_v54  ;;  %v3491_v37 = vpop.f32.mrf.mxu3 }
 0x164   : > { %4019 = vst [vmem:[#allocation25_spill] sm:$0xff] %v3491_v37 }
 0x165   : > { %v3493_v39 = vpop.f32.mrf.mxu0  ;;  %v3495_v25 = vpop.f32.mrf.mxu1 }
 0x166   : > { %4020 = vst [vmem:[#allocation26_spill] sm:$0xff] %v3493_v39 }
 0x167   : > { %1376 = vmatmul.bf16.gmra.mxu2 %v3256_v42 }
 0x168   : > { %1618 = vmatmul.bf16.gmra.mxu1 %v3293_v30 }
 0x16a   : > { %v3499_v4 = vpop.f32.mrf.mxu2 }
 0x16b   : > { %4021 = vst [vmem:[#allocation27_spill] sm:$0xff] %v3499_v4  ;;  %v3501_v58 = vpop.f32.mrf.mxu3 }
 0x16c   : > { %4022 = vst [vmem:[#allocation28_spill] sm:$0xff] %v3501_v58 }
 0x16d   : > { %v3503_v5 = vpop.f32.mrf.mxu0  ;;  %v3505_v55 = vpop.f32.mrf.mxu1 }
 0x16e   : > { %4023 = vst [vmem:[#allocation29_spill] sm:$0xff] %v3503_v5 }
 0x170   : > { %1119 = vmatmul.bf16.gmra.mxu0 %v3339_v56  ;;  %2269 = vmatmul.msk.bf16.gmra.mxu3 %vm660_vm2, %v3364_v26 }
 0x172   : > { %v3510_v39 = vpop.f32.mrf.mxu2 }
 0x173   : > { %4024 = vst [vmem:[#allocation30_spill] sm:$0xff] %v3510_v39  ;;  %v3512_v37 = vpop.f32.mrf.mxu3  ;;  %v4030_v39 = vld [vmem:[#allocation17_spill] sm:$0xff] }
 0x174   : > { %4025 = vst [vmem:[#allocation31_spill] sm:$0xff] %v3512_v37 }
 0x175   : > { %v3514_v54 = vpop.f32.mrf.mxu0  ;;  %v3516_v30 = vpop.f32.mrf.mxu1 }
 0x176   : > { %4026 = vst [vmem:[#allocation32_spill] sm:$0xff] %v3514_v54 }
 0x177   : > { %1381 = vmatmul.bf16.gmra.mxu2 %v3301_v1 }
 0x178   : > { %1623 = vmatmul.bf16.gmra.mxu1 %v3337_v59 }
 0x17a   : > { %v3520_v5 = vpop.f32.mrf.mxu2 }
 0x17b   : > { %4027 = vst [vmem:[#allocation33_spill] sm:$0xff] %v3520_v5  ;;  %v3522_v58 = vpop.f32.mrf.mxu3 }
 0x17c   : > { %4028 = vst [vmem:[#allocation34_spill] sm:$0xff] %v3522_v58 }
 0x17d   : > { %v3524_v4 = vpop.f32.mrf.mxu0  ;;  %v3526_v6 = vpop.f32.mrf.mxu1 }
 0x17e   : > { %4029 = vst [vmem:[#allocation35_spill] sm:$0xff] %v3524_v4 }
 0x180   : > { %1124 = vmatmul.bf16.gmra.mxu0 %v3366_v12  ;;  %2270 = vmatmul.msk.bf16.gmra.mxu3 %vm660_vm2, %v4030_v39 }
 0x182   : > { %v3531_v54 = vpop.f32.mrf.mxu2 }
 0x183   : > { %4031 = vst [vmem:[#allocation17_spill] sm:$0xff] %v3531_v54  ;;  %v3533_v37 = vpop.f32.mrf.mxu3 }
 0x184   : > { %4032 = vst [vmem:[#allocation36_spill] sm:$0xff] %v3533_v37 }
 0x185   : > { %v3535_v41 = vpop.f32.mrf.mxu0  ;;  %v3537_v59 = vpop.f32.mrf.mxu1 }
 0x186   : > { %4033 = vst [vmem:[#allocation37_spill] sm:$0xff] %v3535_v41 }
 0x187   : > { %1386 = vmatmul.bf16.gmra.mxu2 %v3339_v56 }
 0x188   : > { %1628 = vmatmul.bf16.gmra.mxu1 %v3135_v3 }
 0x18a   : > { %v3541_v4 = vpop.f32.mrf.mxu2 }
 0x18b   : > { %4034 = vst [vmem:[#allocation38_spill] sm:$0xff] %v3541_v4  ;;  %v3543_v58 = vpop.f32.mrf.mxu3 }
 0x18c   : > { %4035 = vst [vmem:[#allocation39_spill] sm:$0xff] %v3543_v58 }
 0x18d   : > { %v1090_v5 = vpop.f32.mrf.mxu0  ;;  %v3545_v33 = vpop.f32.mrf.mxu1 }
 0x18e   : > { %v1180_v58 = vadd.f32 %v3410_v18, %v1090_v5 }
 0x190   : > { %1129 = vmatmul.bf16.gmra.mxu0 %v3389_v38  ;;  %2271 = vmatmul.msk.bf16.gmra.mxu3 %vm660_vm2, %v3133_v15 }
 0x192   : > { %v3550_v41 = vpop.f32.mrf.mxu2 }
 0x193   : > { %4036 = vst [vmem:[#allocation40_spill] sm:$0xff] %v3550_v41  ;;  %v3552_v37 = vpop.f32.mrf.mxu3  ;;  %v223_v41 = vld [vmem:[%s2682_s27 + $0xcc] sm:$0xff]   ;;  %s158_s27 = sand.u32 1, %s2586_s10  }
 0x194   : > { %4037 = vst [vmem:[#allocation41_spill] sm:$0xff] %v3552_v37  ;;  %v3569_v37 = vunpack.c.l.bf16 %v223_v41  ;;  %v3571_v51 = vunpack.c.h.bf16 %v223_v41  ;;  %s1934_s25 = scalar_lea.sflag [#allocation3], %s158_s27 }
 0x195   : > { %v1092_v54 = vpop.f32.mrf.mxu0  ;;  %v3554_v3 = vpop.f32.mrf.mxu1 }
 0x196   : > { %v420_v18 = vrot.slane %v3569_v37, 1  ;;  %v421_v5 = vrot.slane %v3571_v51, 1 }
 0x197   : > { %1391 = vmatmul.bf16.gmra.mxu2 %v3366_v12 }
 0x198   : > { %1633 = vmatmul.bf16.gmra.mxu1 %v3160_v14  ;;  %v4039_v14 = vld [vmem:[#allocation16_spill] sm:$0xff]  ;;  %v422_v41 = vsel %vm334_vm0, %v420_v18, %v421_v5 }
 0x19a   : > { %v1352_v4 = vpop.f32.mrf.mxu2 }
 0x19b   : > { %v3559_v57 = vadd.f32 %v1352_v4, %v1180_v58  ;;  %v3561_v44 = vpop.f32.mrf.mxu3  ;;  %v423_v58 = vrot.slane %v279_v20, 1  ;;  %v1182_v4 = vadd.f32 %v3421_v32, %v1092_v54 }
 0x19c   : > { %4038 = vst [vmem:[#allocation42_spill] sm:$0xff] %v3561_v44 }
 0x19d   : > { %v1095_v13 = vpop.f32.mrf.mxu0  ;;  %v3563_v15 = vpop.f32.mrf.mxu1  ;;  %v424_v10 = vsel %vm334_vm0, %v421_v5, %v423_v58 }
 0x19e   : > { %v2519_v28 = vpack.i.bf16 %v424_v10, %v422_v41  ;;  %v1185_v32 = vadd.f32 %v3432_v53, %v1095_v13 }
 0x1a0   : > { %2113 = vmatmul.msk.bf16.vlgmr.msrb.gmra.mxu0 %vm660_vm2, %v4039_v14  ;;  %2272 = vmatmul.msk.bf16.gmra.mxu3 %vm660_vm2, %v3181_v52 }
 0x1a1   : > { %2520 = vrot.lane.b32.xlu2 %v2519_v28, %s2604_s28  ;;  %s2039_s28 = sshll.u32 %s158_s27, 8 }
 0x1a2   : > { %v1354_v44 = vpop.f32.mrf.mxu2  ;;  %s3739_s15 = scalar_lea.vmem [#allocation2], %s2039_s28 }
 0x1a3   : > { %v3585_v0 = vadd.f32 %v1354_v44, %v1182_v4  ;;  %v3587_v16 = vpop.f32.mrf.mxu3  ;;  %s1949_s24 = sshll.u32 %s3739_s15, 4  ;;  %s1950_s24 = int_to_ptr.vmem [resolvable:$true] %s1949_s24 }
 0x1a5   : > { %v1097_v52 = vpop.f32.mrf.mxu0  ;;  %v3589_v21 = vpop.f32.mrf.mxu1 }
 0x1a7   : > { %2177 = vmatmul.msk.bf16.vlgmr.msrb.gmra.mxu2 %vm660_vm2, %v3129_v9  ;;  %v1187_v9 = vadd.f32 %v3442_v62, %v1097_v52 }
 0x1a8   : > { %1638 = vmatmul.bf16.gmra.mxu1 %v3162_v36 }
 0x1aa   : > { %v1357_v54 = vpop.f32.mrf.mxu2 }
 0x1ab   : > { %v3596_v18 = vadd.f32 %v1357_v54, %v1185_v32  ;;  %v3598_v44 = vpop.f32.mrf.mxu3 }
 0x1ad   : > { %v1100_v5 = vpop.f32.mrf.mxu0  ;;  %v3600_v58 = vpop.f32.mrf.mxu1 }
 0x1ae   : > { %v1190_v41 = vadd.f32 %v3453_v8, %v1100_v5 }
 0x1b0   : > { %2114 = vmatmul.msk.bf16.gmra.mxu0 %vm660_vm2, %v3201_v61  ;;  %2273 = vmatmul.msk.bf16.gmra.mxu3 %vm660_vm2, %v3228_v31 }
 0x1b2   : > { %v1359_v28 = vpop.f32.mrf.mxu2 }
 0x1b3   : > { %v3607_v36 = vadd.f32 %v1359_v28, %v1187_v9  ;;  %v1693_v53 = vpop.f32.mrf.mxu3 }
 0x1b5   : > { %v1102_v10 = vpop.f32.mrf.mxu0  ;;  %v1604_v13 = vpop.f32.mrf.mxu1 }
 0x1b6   : > { %v3609_v4 = vadd.f32 %v1693_v53, %v1604_v13 }
 0x1b7   : > { %2178 = vmatmul.msk.bf16.gmra.mxu2 %vm660_vm2, %v4039_v14  ;;  %v1192_v14 = vadd.f32 %v3463_v2, %v1102_v10 }
 0x1b8   : > { %1643 = vmatmul.bf16.gmra.mxu1 %v3183_v7 }
 0x1ba   : > { %v1362_v32 = vpop.f32.mrf.mxu2 }
 0x1bb   : > { %v3615_v54 = vadd.f32 %v1362_v32, %v1190_v41  ;;  %v1695_v31 = vpop.f32.mrf.mxu3 }
 0x1bd   : > { %v1105_v62 = vpop.f32.mrf.mxu0  ;;  %v1606_v52 = vpop.f32.mrf.mxu1 }
 0x1be   : > { %v3617_v9 = vadd.f32 %v1695_v31, %v1606_v52  ;;  %v1195_v41 = vadd.f32 %v3474_v50, %v1105_v62 }
 0x1c0   : > { %2115 = vmatmul.msk.bf16.gmra.mxu0 %vm660_vm2, %v3246_v63  ;;  %2274 = vmatmul.msk.bf16.gmra.mxu3 %vm660_vm2, %v3276_v47 }
 0x1c2   : > { %v1364_v28 = vpop.f32.mrf.mxu2 }
 0x1c3   : > { %v3624_v7 = vadd.f32 %v1364_v28, %v1192_v14  ;;  %v1698_v8 = vpop.f32.mrf.mxu3 }
 0x1c5   : > { %v1107_v5 = vpop.f32.mrf.mxu0  ;;  %v1609_v53 = vpop.f32.mrf.mxu1 }
 0x1c6   : > { %v3626_v13 = vadd.f32 %v1698_v8, %v1609_v53 }
 0x1c7   : > { %2179 = vmatmul.msk.bf16.gmra.mxu2 %vm660_vm2, %v3201_v61  ;;  %v1197_v61 = vadd.f32 %v3484_v17, %v1107_v5 }
 0x1c8   : > { %1648 = vmatmul.bf16.gmra.mxu1 %v3211_v22 }
 0x1ca   : > { %v1367_v32 = vpop.f32.mrf.mxu2 }
 0x1cb   : > { %v3632_v31 = vadd.f32 %v1367_v32, %v1195_v41  ;;  %v1700_v47 = vpop.f32.mrf.mxu3 }
 0x1cd   : > { %v1110_v2 = vpop.f32.mrf.mxu0  ;;  %v1611_v10 = vpop.f32.mrf.mxu1 }
 0x1ce   : > { %v3634_v52 = vadd.f32 %v1700_v47, %v1611_v10  ;;  %v1200_v53 = vadd.f32 %v3495_v25, %v1110_v2 }
 0x1d0   : > { %2116 = vmatmul.msk.bf16.gmra.mxu0 %vm660_vm2, %v3291_v49  ;;  %2275 = vmatmul.msk.bf16.gmra.mxu3 %vm660_vm2, %v3321_v27 }
 0x1d2   : > { %v1369_v14 = vpop.f32.mrf.mxu2 }
 0x1d3   : > { %v3641_v22 = vadd.f32 %v1369_v14, %v1197_v61  ;;  %v1703_v50 = vpop.f32.mrf.mxu3 }
 0x1d5   : > { %v1112_v62 = vpop.f32.mrf.mxu0  ;;  %v1614_v28 = vpop.f32.mrf.mxu1 }
 0x1d6   : > { %v3643_v8 = vadd.f32 %v1703_v50, %v1614_v28 }
 0x1d7   : > { %2180 = vmatmul.msk.bf16.gmra.mxu2 %vm660_vm2, %v3246_v63  ;;  %v1202_v63 = vadd.f32 %v3505_v55, %v1112_v62 }
 0x1d8   : > { %1653 = vmatmul.bf16.gmra.mxu1 %v3256_v42 }
 0x1da   : > { %v1372_v41 = vpop.f32.mrf.mxu2 }
 0x1db   : > { %v3649_v32 = vadd.f32 %v1372_v41, %v1200_v53  ;;  %v1705_v27 = vpop.f32.mrf.mxu3 }
 0x1dd   : > { %v1115_v17 = vpop.f32.mrf.mxu0  ;;  %v1616_v5 = vpop.f32.mrf.mxu1 }
 0x1de   : > { %v3651_v47 = vadd.f32 %v1705_v27, %v1616_v5  ;;  %v1205_v50 = vadd.f32 %v3516_v30, %v1115_v17 }
 0x1e0   : > { %2117 = vmatmul.msk.bf16.gmra.mxu0 %vm660_vm2, %v3335_v43  ;;  %2276 = vmatmul.msk.bf16.gmra.mxu3 %vm660_vm2, %v3353_v35 }
 0x1e2   : > { %v1374_v10 = vpop.f32.mrf.mxu2 }
 0x1e3   : > { %v3658_v42 = vadd.f32 %v1374_v10, %v1202_v63  ;;  %v1708_v25 = vpop.f32.mrf.mxu3 }
 0x1e5   : > { %v1117_v2 = vpop.f32.mrf.mxu0  ;;  %v1619_v61 = vpop.f32.mrf.mxu1 }
 0x1e6   : > { %v3660_v14 = vadd.f32 %v1708_v25, %v1619_v61 }
 0x1e7   : > { %2181 = vmatmul.msk.bf16.gmra.mxu2 %vm660_vm2, %v3291_v49  ;;  %v1207_v49 = vadd.f32 %v3526_v6, %v1117_v2 }
 0x1e8   : > { %1658 = vmatmul.bf16.gmra.mxu1 %v3301_v1 }
 0x1ea   : > { %v1377_v28 = vpop.f32.mrf.mxu2 }
 0x1eb   : > { %v3666_v53 = vadd.f32 %v1377_v28, %v1205_v50  ;;  %v1710_v35 = vpop.f32.mrf.mxu3 }
 0x1ed   : > { %v1120_v55 = vpop.f32.mrf.mxu0  ;;  %v1621_v62 = vpop.f32.mrf.mxu1 }
 0x1ee   : > { %v3668_v41 = vadd.f32 %v1710_v35, %v1621_v62  ;;  %v1210_v10 = vadd.f32 %v3537_v59, %v1120_v55 }
 0x1f0   : > { %2118 = vmatmul.msk.bf16.gmra.mxu0 %vm660_vm2, %v3364_v26  ;;  %2277 = vmatmul.msk.bf16.gmra.mxu3 %vm660_vm2, %v3375_v11 }
 0x1f2   : > { %v1379_v27 = vpop.f32.mrf.mxu2 }
 0x1f3   : > { %v3675_v1 = vadd.f32 %v1379_v27, %v1207_v49  ;;  %v1713_v30 = vpop.f32.mrf.mxu3 }
 0x1f5   : > { %v1122_v17 = vpop.f32.mrf.mxu0  ;;  %v1624_v5 = vpop.f32.mrf.mxu1 }
 0x1f6   : > { %v3677_v63 = vadd.f32 %v1713_v30, %v1624_v5  ;;  %v619_v30 = vrot.slane %v3569_v37, 2 }
 0x1f7   : > { %2182 = vmatmul.msk.bf16.gmra.mxu2 %vm660_vm2, %v3335_v43  ;;  %v1212_v43 = vadd.f32 %v3545_v33, %v1122_v17  ;;  %v620_v17 = vrot.slane %v3571_v51, 2 }
 0x1f8   : > { %1663 = vmatmul.bf16.gmra.mxu1 %v3339_v56 }
 0x1fa   : > { %v1382_v25 = vpop.f32.mrf.mxu2 }
 0x1fb   : > { %v3683_v61 = vadd.f32 %v1382_v25, %v1210_v10  ;;  %v1715_v11 = vpop.f32.mrf.mxu3  ;;  %v2521_v27 = vpop.permute.xlu2 %2520  ;;  %v622_v25 = vrot.slane %v279_v20, 2 }
 0x1fd   : > { %v1125_v6 = vpop.f32.mrf.mxu0  ;;  %v1626_v2 = vpop.f32.mrf.mxu1 }
 0x1fe   : > { %v3685_v50 = vadd.f32 %v1715_v11, %v1626_v2  ;;  %v2523_v11 = vunpack.i.h.bf16 %v2521_v27 }
 0x200   : > { %2119 = vmatmul.msk.bf16.gmra.mxu0 %vm660_vm2, %v4030_v39  ;;  %2278 = vmatmul.msk.bf16.gmra.mxu3 %vm660_vm2, %v3394_v45  ;;  %v1215_v39 = vadd.f32 %v3554_v3, %v1125_v6  ;;  %v623_v6 = vsel %vm533_vm1, %v620_v17, %v622_v25 }
 0x202   : > { %v1384_v28 = vpop.f32.mrf.mxu2 }
 0x203   : > { %v3692_v56 = vadd.f32 %v1384_v28, %v1212_v43  ;;  %v1718_v59 = vpop.f32.mrf.mxu3  ;;  %v696_v43 = vsel %vm660_vm2, %v3571_v51, %v2523_v11 }
 0x205   : > { %v1127_v35 = vpop.f32.mrf.mxu0  ;;  %v1629_v55 = vpop.f32.mrf.mxu1 }
 0x206   : > { %v3694_v62 = vadd.f32 %v1718_v59, %v1629_v55  ;;  %v1217_v3 = vadd.f32 %v3563_v15, %v1127_v35  ;;  %v732_v55 = vpack.c.bf16 %v623_v6, %v696_v43 }
 0x207   : > { %2183 = vmatmul.msk.bf16.gmra.mxu2 %vm660_vm2, %v3364_v26  ;;  %v2522_v26 = vunpack.i.l.bf16 %v2521_v27 }
 0x208   : > { %1668 = vmatmul.bf16.gmra.mxu1 %v3366_v12  ;;  %v621_v12 = vsel %vm533_vm1, %v619_v30, %v620_v17 }
 0x209   : > { %v695_v48 = vsel %vm660_vm2, %v3569_v37, %v2522_v26 }
 0x20a   : > { %v1387_v49 = vpop.f32.mrf.mxu2 }
 0x20b   : > { %v3700_v45 = vadd.f32 %v1387_v49, %v1215_v39  ;;  %v1720_v33 = vpop.f32.mrf.mxu3  ;;  %v731_v39 = vpack.c.bf16 %v621_v12, %v695_v48 }
 0x20d   : > { %v1130_v5 = vpop.f32.mrf.mxu0  ;;  %v1631_v10 = vpop.f32.mrf.mxu1  ;;  %v1514_v15 = vunpack.c.h.b16 %v731_v39 }
 0x20e   : > { %v3706_v2 = vadd.f32 %v1720_v33, %v1631_v10  ;;  %v1516_v33 = vunpack.c.h.b16 %v732_v55  ;;  %v1220_v51 = vadd.f32 %v3589_v21, %v1130_v5 }
 0x210   : > { %2279 = vmatmul.msk.bf16.gmra.mxu3 %vm660_vm2, %v3408_v23  ;;  %v1518_v17 = vpack.c.b16 %v1516_v33, %v1514_v15 }
 0x212   : > { %v1389_v20 = vpop.f32.mrf.mxu2 }
 0x213   : > { %v3717_v28 = vadd.f32 %v1389_v20, %v1217_v3  ;;  %v1723_v59 = vpop.f32.mrf.mxu3  ;;  %v1513_v3 = vunpack.c.l.b16 %v731_v39  ;;  %v1442_v20 = vadd.f32 %v3404_v29, %v3559_v57 }
 0x215   : > { %v1132_v49 = vpop.f32.mrf.mxu0  ;;  %v1634_v23 = vpop.f32.mrf.mxu1 }
 0x216   : > { %v3719_v27 = vadd.f32 %v1723_v59, %v1634_v23  ;;  %v1222_v26 = vadd.f32 %v3600_v58, %v1132_v49 }
 0x218   : > { %1673 = vmatmul.bf16.gmra.mxu1 %v3389_v38  ;;  %v1515_v38 = vunpack.c.l.b16 %v732_v55 }
 0x21a   : > { %v1392_v35 = vpop.f32.mrf.mxu2  ;;  %v1517_v23 = vpack.c.b16 %v1515_v38, %v1513_v3 }
 0x21b   : > { %v3723_v30 = vadd.f32 %v1392_v35, %v1220_v51  ;;  %v1725_v37 = vpop.f32.mrf.mxu3 }
 0x21d   : > { %v1144_v10 = vpop.f32.mrf.mxu0  ;;  %v1636_v25 = vpop.f32.mrf.mxu1 }
 0x21e   : > { %v3725_v11 = vadd.f32 %v1725_v37, %v1636_v25  ;;  %v1145_v5 = vadd.f32 %v1144_v10, %v3399_v19 }
 0x220   : > { %2280 = vmatmul.msk.bf16.gmra.mxu3 %vm660_vm2, %v1518_v17  ;;  %v1318_v58 = vadd.f32 %v3415_v24, %v1145_v5  ;;  %v1444_v24 = vadd.f32 %v3417_v34, %v3585_v0 }
 0x222   : > { %v1394_v12 = vpop.f32.mrf.mxu2 }
 0x223   : > { %v3729_v6 = vadd.f32 %v1394_v12, %v1222_v26  ;;  %v1728_v21 = vpop.f32.mrf.mxu3 }
 0x225   : > { %v1146_v43 = vpop.f32.mrf.mxu0  ;;  %v1639_v48 = vpop.f32.mrf.mxu1 }
 0x226   : > { %v1729_v59 = vadd.f32 %v1728_v21, %v1639_v48  ;;  %v1147_v19 = vadd.f32 %v1146_v43, %v3406_v46  ;;  %v4040_v43 = vld [vmem:[#allocation9_spill] sm:$0xff] }
 0x228   : > { %v1787_v33 = vadd.f32 %v1729_v59, %v1442_v20  ;;  %1678 = vmatmul.bf16.gmra.mxu1 %v1517_v23  ;;  %v1320_v46 = vadd.f32 %v3426_v40, %v1147_v19  ;;  %v1447_v40 = vadd.f32 %v4040_v43, %v3596_v18 }
 0x22a   : > { %vm1819_vm3 = vcmp.ge.f32.partialorder %v1787_v33, 0.0  ;;  %v1851_v55 = vmul.f32 0.2, %v1787_v33  ;;  %v1406_v39 = vpop.f32.mrf.mxu2 }
 0x22b   : > { %v1407_v49 = vadd.f32 %v1406_v39, %v1318_v58  ;;  %v1730_v15 = vpop.f32.mrf.mxu3 }
 0x22c   : > { %v1883_v51 = vsel %vm1819_vm3, %v1787_v33, %v1851_v55  ;;  %v4041_v33 = vld [vmem:[#allocation6_spill] sm:$0xff] }
 0x22d   : > { %1915 = vst.msk [vmem:[%s3739_s15 + $0x70] sm:$0xff] %vm660_vm2, %v1883_v51  ;;  %v1773_v29 = vadd.f32 %v3609_v4, %v1407_v49  ;;  %v1149_v57 = vpop.f32.mrf.mxu0  ;;  %v1641_v35 = vpop.f32.mrf.mxu1 }
 0x22e   : > { %v1731_v37 = vadd.f32 %v1730_v15, %v1641_v35  ;;  %v1150_v21 = vadd.f32 %v1149_v57, %v3419_v60  ;;  %v4042_v15 = vld [vmem:[#allocation8_spill] sm:$0xff]  ;;  %v4043_v57 = vld [vmem:[#allocation7_spill] sm:$0xff] }
 0x22f   : > { %vm1805_vm4 = vcmp.ge.f32.partialorder %v1773_v29, 0.0  ;;  %v1837_v17 = vmul.f32 0.2, %v1773_v29  ;;  %v1449_v35 = vadd.f32 %v4043_v57, %v3607_v36 }
 0x230   : > { %v1788_v10 = vadd.f32 %v1731_v37, %v1444_v24  ;;  %v1323_v58 = vadd.f32 %v4041_v33, %v1150_v21 }
 0x231   : > { %v1869_v25 = vsel %vm1805_vm4, %v1773_v29, %v1837_v17 }
 0x232   : > { %1901 = vst.msk [vmem:[%s3739_s15] sm:$0xff] %vm660_vm2, %v1869_v25  ;;  %vm1820_vm5 = vcmp.ge.f32.partialorder %v1788_v10, 0.0  ;;  %v1852_v26 = vmul.f32 0.2, %v1788_v10  ;;  %v1408_v12 = vpop.f32.mrf.mxu2  ;;  %v4044_v25 = vld [vmem:[#allocation11_spill] sm:$0xff] }
 0x233   : > { %v1409_v4 = vadd.f32 %v1408_v12, %v1320_v46  ;;  %v1733_v3 = vpop.f32.mrf.mxu3 }
 0x234   : > { %v1884_v38 = vsel %vm1820_vm5, %v1788_v10, %v1852_v26 }
 0x235   : > { %1916 = vst.msk [vmem:[%s3739_s15 + $0x78] sm:$0xff] %vm660_vm2, %v1884_v38  ;;  %v1774_v34 = vadd.f32 %v3617_v9, %v1409_v4  ;;  %v1151_v0 = vpop.f32.mrf.mxu0  ;;  %v1644_v5 = vpop.f32.mrf.mxu1  ;;  %v4045_v38 = vld [vmem:[#allocation5_spill] sm:$0xff] }
 0x236   : > { %v1734_v48 = vadd.f32 %v1733_v3, %v1644_v5  ;;  %v1152_v51 = vadd.f32 %v1151_v0, %v4042_v15  ;;  %v4046_v5 = vld [vmem:[#allocation12_spill] sm:$0xff] }
 0x237   : > { %vm1806_vm6 = vcmp.ge.f32.partialorder %v1774_v34, 0.0  ;;  %v1838_v20 = vmul.f32 0.2, %v1774_v34  ;;  %v1452_v43 = vadd.f32 %v4046_v5, %v3615_v54 }
 0x238   : > { %v1789_v59 = vadd.f32 %v1734_v48, %v1447_v40  ;;  %v1325_v46 = vadd.f32 %v4044_v25, %v1152_v51 }
 0x239   : > { %v1870_v23 = vsel %vm1806_vm6, %v1774_v34, %v1838_v20 }
 0x23a   : > { %1902 = vst.msk [vmem:[%s3739_s15 + $0x8] sm:$0xff] %vm660_vm2, %v1870_v23  ;;  %vm1821_vm7 = vcmp.ge.f32.partialorder %v1789_v59, 0.0  ;;  %v1853_v60 = vmul.f32 0.2, %v1789_v59  ;;  %v1411_v55 = vpop.f32.mrf.mxu2  ;;  %v4047_v23 = vld [vmem:[#allocation14_spill] sm:$0xff] }
 0x23b   : > { %v1412_v9 = vadd.f32 %v1411_v55, %v1323_v58  ;;  %v1735_v39 = vpop.f32.mrf.mxu3 }
 0x23c   : > { %v1885_v49 = vsel %vm1821_vm7, %v1789_v59, %v1853_v60 }
 0x23d   : > { %1917 = vst.msk [vmem:[%s3739_s15 + $0x80] sm:$0xff] %vm660_vm2, %v1885_v49  ;;  %v1775_v18 = vadd.f32 %v3626_v13, %v1412_v9  ;;  %v1154_v19 = vpop.f32.mrf.mxu0  ;;  %v1646_v29 = vpop.f32.mrf.mxu1 }
 0x23e   : > { %v1736_v24 = vadd.f32 %v1735_v39, %v1646_v29  ;;  %v1155_v21 = vadd.f32 %v1154_v19, %v4045_v38  ;;  %v4048_v39 = vld [vmem:[#allocation10_spill] sm:$0xff]  ;;  %v4052_v38 = vld [vmem:[#allocation19_spill] sm:$0xff] }
 0x23f   : > { %vm1807_vm8 = vcmp.ge.f32.partialorder %v1775_v18, 0.0  ;;  %v1839_v37 = vmul.f32 0.2, %v1775_v18 }
 0x240   : > { %v1790_v17 = vadd.f32 %v1736_v24, %v1449_v35  ;;  %v1328_v33 = vadd.f32 %v4047_v23, %v1155_v21  ;;  %v1457_v21 = vadd.f32 %v4052_v38, %v3632_v31 }
 0x241   : > { %v1871_v10 = vsel %vm1807_vm8, %v1775_v18, %v1839_v37  ;;  %v4049_v18 = vld [vmem:[#allocation15_spill] sm:$0xff]  ;;  %v4050_v37 = vld [vmem:[#allocation18_spill] sm:$0xff] }
 0x242   : > { %1903 = vst.msk [vmem:[%s3739_s15 + $0x10] sm:$0xff] %vm660_vm2, %v1871_v10  ;;  %vm1822_vm9 = vcmp.ge.f32.partialorder %v1790_v17, 0.0  ;;  %v1854_v26 = vmul.f32 0.2, %v1790_v17  ;;  %v1413_v12 = vpop.f32.mrf.mxu2  ;;  %v1454_v19 = vadd.f32 %v4049_v18, %v3624_v7 }
 0x243   : > { %v1414_v13 = vadd.f32 %v1413_v12, %v1325_v46  ;;  %v1738_v4 = vpop.f32.mrf.mxu3  ;;  %v4051_v12 = vld [vmem:[#allocation13_spill] sm:$0xff] }
 0x244   : > { %v1886_v3 = vsel %vm1822_vm9, %v1790_v17, %v1854_v26 }
 0x245   : > { %1918 = vst.msk [vmem:[%s3739_s15 + $0x88] sm:$0xff] %vm660_vm2, %v1886_v3  ;;  %v1776_v36 = vadd.f32 %v3634_v52, %v1414_v13  ;;  %v1156_v34 = vpop.f32.mrf.mxu0  ;;  %v1649_v0 = vpop.f32.mrf.mxu1 }
 0x246   : > { %v1739_v40 = vadd.f32 %v1738_v4, %v1649_v0  ;;  %v1157_v49 = vadd.f32 %v1156_v34, %v4048_v39 }
 0x247   : > { %vm1808_vm10 = vcmp.ge.f32.partialorder %v1776_v36, 0.0  ;;  %v1840_v48 = vmul.f32 0.2, %v1776_v36 }
 0x248   : > { %v1791_v20 = vadd.f32 %v1739_v40, %v1452_v43  ;;  %v1330_v17 = vadd.f32 %v4050_v37, %v1157_v49  ;;  %v4053_v43 = vld [vmem:[#allocation21_spill] sm:$0xff] }
 0x249   : > { %v1872_v59 = vsel %vm1808_vm10, %v1776_v36, %v1840_v48 }
 0x24a   : > { %1904 = vst.msk [vmem:[%s3739_s15 + $0x18] sm:$0xff] %vm660_vm2, %v1872_v59  ;;  %vm1823_vm11 = vcmp.ge.f32.partialorder %v1791_v20, 0.0  ;;  %v1855_v58 = vmul.f32 0.2, %v1791_v20  ;;  %v1416_v60 = vpop.f32.mrf.mxu2 }
 0x24b   : > { %v1417_v52 = vadd.f32 %v1416_v60, %v1328_v33  ;;  %v1740_v55 = vpop.f32.mrf.mxu3  ;;  %v4054_v33 = vld [vmem:[#allocation20_spill] sm:$0xff] }
 0x24c   : > { %v1887_v9 = vsel %vm1823_vm11, %v1791_v20, %v1855_v58 }
 0x24d   : > { %1919 = vst.msk [vmem:[%s3739_s15 + $0x90] sm:$0xff] %vm660_vm2, %v1887_v9  ;;  %v1777_v54 = vadd.f32 %v3643_v8, %v1417_v52  ;;  %v1159_v15 = vpop.f32.mrf.mxu0  ;;  %v1651_v51 = vpop.f32.mrf.mxu1 }
 0x24e   : > { %v1741_v29 = vadd.f32 %v1740_v55, %v1651_v51  ;;  %v1160_v13 = vadd.f32 %v1159_v15, %v4051_v12  ;;  %v4055_v55 = vld [vmem:[#allocation22_spill] sm:$0xff]  ;;  %v4056_v51 = vld [vmem:[#allocation24_spill] sm:$0xff] }
 0x24f   : > { %vm1809_vm12 = vcmp.ge.f32.partialorder %v1777_v54, 0.0  ;;  %v1841_v57 = vmul.f32 0.2, %v1777_v54  ;;  %v1459_v9 = vadd.f32 %v4055_v55, %v3641_v22 }
 0x250   : > { %v1792_v35 = vadd.f32 %v1741_v29, %v1454_v19  ;;  %v1333_v40 = vadd.f32 %v4053_v43, %v1160_v13 }
 0x251   : > { %v1873_v24 = vsel %vm1809_vm12, %v1777_v54, %v1841_v57 }
 0x252   : > { %1905 = vst.msk [vmem:[%s3739_s15 + $0x20] sm:$0xff] %vm660_vm2, %v1873_v24  ;;  %vm1824_vm13 = vcmp.ge.f32.partialorder %v1792_v35, 0.0  ;;  %v1856_v10 = vmul.f32 0.2, %v1792_v35  ;;  %v1418_v25 = vpop.f32.mrf.mxu2  ;;  %v4057_v24 = vld [vmem:[#allocation23_spill] sm:$0xff] }
 0x253   : > { %v1419_v8 = vadd.f32 %v1418_v25, %v1330_v17  ;;  %v1743_v46 = vpop.f32.mrf.mxu3  ;;  %v4058_v25 = vld [vmem:[#allocation25_spill] sm:$0xff] }
 0x254   : > { %v1888_v26 = vsel %vm1824_vm13, %v1792_v35, %v1856_v10 }
 0x255   : > { %1920 = vst.msk [vmem:[%s3739_s15 + $0x98] sm:$0xff] %vm660_vm2, %v1888_v26  ;;  %v1778_v7 = vadd.f32 %v3651_v47, %v1419_v8  ;;  %v1161_v4 = vpop.f32.mrf.mxu0  ;;  %v1654_v3 = vpop.f32.mrf.mxu1  ;;  %v1462_v8 = vadd.f32 %v4058_v25, %v3649_v32 }
 0x256   : > { %v1744_v36 = vadd.f32 %v1743_v46, %v1654_v3  ;;  %v1162_v58 = vadd.f32 %v1161_v4, %v4054_v33  ;;  %v4062_v33 = vld [vmem:[#allocation30_spill] sm:$0xff] }
 0x257   : > { %vm1810_vm14 = vcmp.ge.f32.partialorder %v1778_v7, 0.0  ;;  %v1842_v34 = vmul.f32 0.2, %v1778_v7 }
 0x258   : > { %v1793_v0 = vadd.f32 %v1744_v36, %v1457_v21  ;;  %v1335_v18 = vadd.f32 %v4056_v51, %v1162_v58 }
 0x259   : > { %v1874_v5 = vsel %vm1810_vm14, %v1778_v7, %v1842_v34  ;;  %v4059_v7 = vld [vmem:[#allocation27_spill] sm:$0xff]  ;;  %v4060_v34 = vld [vmem:[#allocation26_spill] sm:$0xff] }
 0x25a   : > { %1906 = vst.msk [vmem:[%s3739_s15 + $0x28] sm:$0xff] %vm660_vm2, %v1874_v5  ;;  %vm1825_vm15 = vcmp.ge.f32.partialorder %v1793_v0, 0.0  ;;  %v1857_v48 = vmul.f32 0.2, %v1793_v0  ;;  %v1421_v20 = vpop.f32.mrf.mxu2 }
 0x25b   : > { %v1422_v47 = vadd.f32 %v1421_v20, %v1333_v40  ;;  %v1745_v59 = vpop.f32.mrf.mxu3  ;;  %v4061_v40 = vld [vmem:[#allocation28_spill] sm:$0xff] }
 0x25c   : > { %v1889_v23 = vsel %vm1825_vm15, %v1793_v0, %v1857_v48  ;;  %v1464_v48 = vadd.f32 %v4061_v40, %v3658_v42  ;;  %v4070_v40 = vld [vmem:[#allocation36_spill] sm:$0xff] }
 0x25d   : > { %1921 = vst.msk [vmem:[%s3739_s15 + $0xa0] sm:$0xff] %vm660_vm2, %v1889_v23  ;;  %v1779_v31 = vadd.f32 %v3660_v14, %v1422_v47  ;;  %v1164_v60 = vpop.f32.mrf.mxu0  ;;  %v1656_v52 = vpop.f32.mrf.mxu1 }
 0x25e   : > { %v1746_v39 = vadd.f32 %v1745_v59, %v1656_v52  ;;  %v1165_v37 = vadd.f32 %v1164_v60, %v4057_v24 }
 0x25f   : > { %vm1811_vm0 = vcmp.ge.f32.partialorder %v1779_v31, 0.0  ;;  %v1843_v49 = vmul.f32 0.2, %v1779_v31 }
 0x260   : > { %v1794_v54 = vadd.f32 %v1746_v39, %v1459_v9  ;;  %v1338_v4 = vadd.f32 %v4059_v7, %v1165_v37  ;;  %v4063_v9 = vld [vmem:[#allocation29_spill] sm:$0xff] }
 0x261   : > { %v1875_v15 = vsel %vm1811_vm0, %v1779_v31, %v1843_v49 }
 0x262   : > { %1907 = vst.msk [vmem:[%s3739_s15 + $0x30] sm:$0xff] %vm660_vm2, %v1875_v15  ;;  %vm1826_vm1 = vcmp.ge.f32.partialorder %v1794_v54, 0.0  ;;  %v1858_v19 = vmul.f32 0.2, %v1794_v54  ;;  %v1423_v29 = vpop.f32.mrf.mxu2 }
 0x263   : > { %v1424_v14 = vadd.f32 %v1423_v29, %v1335_v18  ;;  %v1748_v57 = vpop.f32.mrf.mxu3 }
 0x264   : > { %v1890_v35 = vsel %vm1826_vm1, %v1794_v54, %v1858_v19  ;;  %v4064_v54 = vld [vmem:[#allocation31_spill] sm:$0xff] }
 0x265   : > { %1922 = vst.msk [vmem:[%s3739_s15 + $0xa8] sm:$0xff] %vm660_vm2, %v1890_v35  ;;  %v1780_v22 = vadd.f32 %v3668_v41, %v1424_v14  ;;  %v1166_v17 = vpop.f32.mrf.mxu0  ;;  %v1659_v10 = vpop.f32.mrf.mxu1  ;;  %v1467_v15 = vadd.f32 %v4064_v54, %v3666_v53 }
 0x266   : > { %v1749_v46 = vadd.f32 %v1748_v57, %v1659_v10  ;;  %v1167_v0 = vadd.f32 %v1166_v17, %v4060_v34  ;;  %v4065_v57 = vld [vmem:[#allocation33_spill] sm:$0xff]  ;;  %v4066_v10 = vld [vmem:[#allocation32_spill] sm:$0xff] }
 0x267   : > { %vm1812_vm3 = vcmp.ge.f32.partialorder %v1780_v22, 0.0  ;;  %v1844_v26 = vmul.f32 0.2, %v1780_v22 }
 0x268   : > { %v1795_v12 = vadd.f32 %v1749_v46, %v1462_v8  ;;  %v1340_v58 = vadd.f32 %v4062_v33, %v1167_v0  ;;  %v4067_v46 = vld [vmem:[#allocation34_spill] sm:$0xff] }
 0x269   : > { %v1876_v13 = vsel %vm1812_vm3, %v1780_v22, %v1844_v26  ;;  %v1469_v26 = vadd.f32 %v4067_v46, %v3675_v1  ;;  %v4071_v33 = vld [vmem:[#allocation38_spill] sm:$0xff] }
 0x26a   : > { %1908 = vst.msk [vmem:[%s3739_s15 + $0x38] sm:$0xff] %vm660_vm2, %v1876_v13  ;;  %vm1827_vm4 = vcmp.ge.f32.partialorder %v1795_v12, 0.0  ;;  %v1859_v3 = vmul.f32 0.2, %v1795_v12  ;;  %v1426_v38 = vpop.f32.mrf.mxu2 }
 0x26b   : > { %v1427_v41 = vadd.f32 %v1426_v38, %v1338_v4  ;;  %v1750_v21 = vpop.f32.mrf.mxu3  ;;  %v4068_v38 = vld [vmem:[#allocation17_spill] sm:$0xff] }
 0x26c   : > { %v1891_v36 = vsel %vm1827_vm4, %v1795_v12, %v1859_v3 }
 0x26d   : > { %1923 = vst.msk [vmem:[%s3739_s15 + $0xb0] sm:$0xff] %vm660_vm2, %v1891_v36  ;;  %v1781_v32 = vadd.f32 %v3677_v63, %v1427_v41  ;;  %v1169_v5 = vpop.f32.mrf.mxu0  ;;  %v1661_v43 = vpop.f32.mrf.mxu1 }
 0x26e   : > { %v1751_v20 = vadd.f32 %v1750_v21, %v1661_v43  ;;  %v1170_v39 = vadd.f32 %v1169_v5, %v4063_v9  ;;  %v4072_v9 = vld [vmem:[#allocation37_spill] sm:$0xff] }
 0x26f   : > { %vm1813_vm5 = vcmp.ge.f32.partialorder %v1781_v32, 0.0  ;;  %v1845_v47 = vmul.f32 0.2, %v1781_v32 }
 0x270   : > { %v1796_v59 = vadd.f32 %v1751_v20, %v1464_v48  ;;  %v1343_v35 = vadd.f32 %v4065_v57, %v1170_v39  ;;  %v1472_v48 = vadd.f32 %v4070_v40, %v3683_v61 }
 0x271   : > { %v1877_v23 = vsel %vm1813_vm5, %v1781_v32, %v1845_v47  ;;  %v4069_v32 = vld [vmem:[#allocation35_spill] sm:$0xff] }
 0x272   : > { %1909 = vst.msk [vmem:[%s3739_s15 + $0x40] sm:$0xff] %vm660_vm2, %v1877_v23  ;;  %vm1828_vm6 = vcmp.ge.f32.partialorder %v1796_v59, 0.0  ;;  %v1860_v31 = vmul.f32 0.2, %v1796_v59  ;;  %v1428_v60 = vpop.f32.mrf.mxu2 }
 0x273   : > { %v1429_v63 = vadd.f32 %v1428_v60, %v1340_v58  ;;  %v1753_v52 = vpop.f32.mrf.mxu3 }
 0x274   : > { %v1892_v55 = vsel %vm1828_vm6, %v1796_v59, %v1860_v31 }
 0x275   : > { %1924 = vst.msk [vmem:[%s3739_s15 + $0xb8] sm:$0xff] %vm660_vm2, %v1892_v55  ;;  %v1782_v42 = vadd.f32 %v3685_v50, %v1429_v63  ;;  %v1664_v49 = vpop.f32.mrf.mxu1  ;;  %v1171_v51 = vpop.f32.mrf.mxu0 }
 0x276   : > { %v1754_v18 = vadd.f32 %v1753_v52, %v1664_v49  ;;  %v1172_v53 = vadd.f32 %v1171_v51, %v4066_v10  ;;  %v4073_v49 = vld [vmem:[#allocation39_spill] sm:$0xff] }
 0x277   : > { %vm1814_vm7 = vcmp.ge.f32.partialorder %v1782_v42, 0.0  ;;  %v1846_v19 = vmul.f32 0.2, %v1782_v42  ;;  %v1474_v54 = vadd.f32 %v4073_v49, %v3692_v56 }
 0x278   : > { %v1797_v29 = vadd.f32 %v1754_v18, %v1467_v15  ;;  %v1345_v41 = vadd.f32 %v4068_v38, %v1172_v53 }
 0x279   : > { %v1878_v14 = vsel %vm1814_vm7, %v1782_v42, %v1846_v19 }
 0x27a   : > { %1910 = vst.msk [vmem:[%s3739_s15 + $0x48] sm:$0xff] %vm660_vm2, %v1878_v14  ;;  %vm1829_vm8 = vcmp.ge.f32.partialorder %v1797_v29, 0.0  ;;  %v1861_v24 = vmul.f32 0.2, %v1797_v29  ;;  %v1431_v37 = vpop.f32.mrf.mxu2 }
 0x27b   : > { %v1432_v50 = vadd.f32 %v1431_v37, %v1343_v35  ;;  %v1755_v22 = vpop.f32.mrf.mxu3 }
 0x27c   : > { %v1893_v17 = vsel %vm1829_vm8, %v1797_v29, %v1861_v24  ;;  %v4074_v29 = vld [vmem:[#allocation40_spill] sm:$0xff] }
 0x27d   : > { %1925 = vst.msk [vmem:[%s3739_s15 + $0xc0] sm:$0xff] %vm660_vm2, %v1893_v17  ;;  %v1783_v25 = vadd.f32 %v3694_v62, %v1432_v50  ;;  %v1666_v8 = vpop.f32.mrf.mxu1  ;;  %v1174_v7 = vpop.f32.mrf.mxu0 }
 0x27e   : > { %v1756_v12 = vadd.f32 %v1755_v22, %v1666_v8  ;;  %v1175_v1 = vadd.f32 %v1174_v7, %v4069_v32  ;;  %v4075_v22 = vld [vmem:[#allocation41_spill] sm:$0xff] }
 0x27f   : > { %vm1815_vm9 = vcmp.ge.f32.partialorder %v1783_v25, 0.0  ;;  %v1847_v13 = vmul.f32 0.2, %v1783_v25  ;;  %v1477_v17 = vadd.f32 %v4075_v22, %v3700_v45 }
 0x280   : > { %v1798_v4 = vadd.f32 %v1756_v12, %v1469_v26  ;;  %v1348_v58 = vadd.f32 %v4071_v33, %v1175_v1 }
 0x281   : > { %v1879_v3 = vsel %vm1815_vm9, %v1783_v25, %v1847_v13  ;;  %v4076_v13 = vld [vmem:[#allocation42_spill] sm:$0xff] }
 0x282   : > { %1911 = vst.msk [vmem:[%s3739_s15 + $0x50] sm:$0xff] %vm660_vm2, %v1879_v3  ;;  %vm1830_vm10 = vcmp.ge.f32.partialorder %v1798_v4, 0.0  ;;  %v1862_v21 = vmul.f32 0.2, %v1798_v4  ;;  %v1433_v36 = vpop.f32.mrf.mxu2  ;;  %v1479_v7 = vadd.f32 %v4076_v13, %v3717_v28 }
 0x283   : > { %v1434_v62 = vadd.f32 %v1433_v36, %v1345_v41  ;;  %v1758_v34 = vpop.f32.mrf.mxu3  ;;  %v1482_v36 = vadd.f32 %v3587_v16, %v3723_v30 }
 0x284   : > { %v1894_v0 = vsel %vm1830_vm10, %v1798_v4, %v1862_v21 }
 0x285   : > { %1926 = vst.msk [vmem:[%s3739_s15 + $0xc8] sm:$0xff] %vm660_vm2, %v1894_v0  ;;  %v1784_v5 = vadd.f32 %v3706_v2, %v1434_v62  ;;  %v1669_v43 = vpop.f32.mrf.mxu1  ;;  %v1176_v31 = vpop.f32.mrf.mxu0 }
 0x286   : > { %v1759_v20 = vadd.f32 %v1758_v34, %v1669_v43  ;;  %v1177_v61 = vadd.f32 %v1176_v31, %v4072_v9 }
 0x287   : > { %vm1816_vm11 = vcmp.ge.f32.partialorder %v1784_v5, 0.0  ;;  %v1848_v47 = vmul.f32 0.2, %v1784_v5 }
 0x288   : > { %v1799_v59 = vadd.f32 %v1759_v20, %v1472_v48  ;;  %v1350_v14 = vadd.f32 %v4074_v29, %v1177_v61 }
 0x289   : > { %v1880_v23 = vsel %vm1816_vm11, %v1784_v5, %v1848_v47  ;;  %v1484_v5 = vadd.f32 %v3598_v44, %v3729_v6 }
 0x28a   : > { %1912 = vst.msk [vmem:[%s3739_s15 + $0x58] sm:$0xff] %vm660_vm2, %v1880_v23  ;;  %vm1831_vm12 = vcmp.ge.f32.partialorder %v1799_v59, 0.0  ;;  %v1863_v60 = vmul.f32 0.2, %v1799_v59  ;;  %v1436_v63 = vpop.f32.mrf.mxu2 }
 0x28b   : > { %v1437_v2 = vadd.f32 %v1436_v63, %v1348_v58  ;;  %v1760_v52 = vpop.f32.mrf.mxu3 }
 0x28c   : > { %v1895_v55 = vsel %vm1831_vm12, %v1799_v59, %v1863_v60 }
 0x28d   : > { %1927 = vst.msk [vmem:[%s3739_s15 + $0xd0] sm:$0xff] %vm660_vm2, %v1895_v55  ;;  %v1785_v39 = vadd.f32 %v3719_v27, %v1437_v2  ;;  %v1671_v42 = vpop.f32.mrf.mxu1 }
 0x28e   : > { %v1761_v15 = vadd.f32 %v1760_v52, %v1671_v42 }
 0x28f   : > { %vm1817_vm13 = vcmp.ge.f32.partialorder %v1785_v39, 0.0  ;;  %v1849_v51 = vmul.f32 0.2, %v1785_v39 }
 0x290   : > { %v1800_v18 = vadd.f32 %v1761_v15, %v1474_v54 }
 0x291   : > { %v1881_v19 = vsel %vm1817_vm13, %v1785_v39, %v1849_v51 }
 0x292   : > { %1913 = vst.msk [vmem:[%s3739_s15 + $0x60] sm:$0xff] %vm660_vm2, %v1881_v19  ;;  %vm1832_vm14 = vcmp.ge.f32.partialorder %v1800_v18, 0.0  ;;  %v1864_v57 = vmul.f32 0.2, %v1800_v18  ;;  %v1438_v35 = vpop.f32.mrf.mxu2 }
 0x293   : > { %v1439_v24 = vadd.f32 %v1438_v35, %v1350_v14  ;;  %v1763_v27 = vpop.f32.mrf.mxu3 }
 0x294   : > { %v1896_v37 = vsel %vm1832_vm14, %v1800_v18, %v1864_v57 }
 0x295   : > { %1928 = vst.msk [vmem:[%s3739_s15 + $0xd8] sm:$0xff] %vm660_vm2, %v1896_v37  ;;  %v1786_v56 = vadd.f32 %v3725_v11, %v1439_v24  ;;  %v1674_v50 = vpop.f32.mrf.mxu1 }
 0x296   : > { %v1764_v10 = vadd.f32 %v1763_v27, %v1674_v50 }
 0x297   : > { %vm1818_vm15 = vcmp.ge.f32.partialorder %v1786_v56, 0.0  ;;  %v1850_v53 = vmul.f32 0.2, %v1786_v56 }
 0x298   : > { %v1801_v25 = vadd.f32 %v1764_v10, %v1477_v17 }
 0x299   : > { %v1882_v8 = vsel %vm1818_vm15, %v1786_v56, %v1850_v53 }
 0x29a   : > { %1914 = vst.msk [vmem:[%s3739_s15 + $0x68] sm:$0xff] %vm660_vm2, %v1882_v8  ;;  %vm1833_vm0 = vcmp.ge.f32.partialorder %v1801_v25, 0.0  ;;  %v1865_v46 = vmul.f32 0.2, %v1801_v25 }
 0x29b   : > { %v1765_v26 = vpop.f32.mrf.mxu3 }
 0x29c   : > { %v1897_v12 = vsel %vm1833_vm0, %v1801_v25, %v1865_v46 }
 0x29d   : > { %1929 = vst.msk [vmem:[%s3739_s15 + $0xe0] sm:$0xff] %vm660_vm2, %v1897_v12  ;;  %v1676_v11 = vpop.f32.mrf.mxu1 }
 0x29e   : > { %v1766_v45 = vadd.f32 %v1765_v26, %v1676_v11 }
 0x2a0   : > { %v1802_v4 = vadd.f32 %v1766_v45, %v1479_v7 }
 0x2a2   : > { %vm1834_vm1 = vcmp.ge.f32.partialorder %v1802_v4, 0.0  ;;  %v1866_v3 = vmul.f32 0.2, %v1802_v4 }
 0x2a3   : > { %v1768_v38 = vpop.f32.mrf.mxu3 }
 0x2a4   : > { %v1898_v41 = vsel %vm1834_vm1, %v1802_v4, %v1866_v3 }
 0x2a5   : > { %1930 = vst.msk [vmem:[%s3739_s15 + $0xe8] sm:$0xff] %vm660_vm2, %v1898_v41  ;;  %v1679_v21 = vpop.f32.mrf.mxu1 }
 0x2a6   : > { %v1769_v62 = vadd.f32 %v1768_v38, %v1679_v21 }
 0x2a8   : > { %v1803_v34 = vadd.f32 %v1769_v62, %v1482_v36 }
 0x2aa   : > { %vm1835_vm3 = vcmp.ge.f32.partialorder %v1803_v34, 0.0  ;;  %v1867_v0 = vmul.f32 0.2, %v1803_v34 }
 0x2ab   : > { %v1770_v32 = vpop.f32.mrf.mxu3 }
 0x2ac   : > { %v1899_v28 = vsel %vm1835_vm3, %v1803_v34, %v1867_v0 }
 0x2ad   : > { %1931 = vst.msk [vmem:[%s3739_s15 + $0xf0] sm:$0xff] %vm660_vm2, %v1899_v28  ;;  %v1681_v1 = vpop.f32.mrf.mxu1 }
 0x2ae   : > { %v1771_v16 = vadd.f32 %v1770_v32, %v1681_v1 }
 0x2b0   : > { %v1804_v30 = vadd.f32 %v1771_v16, %v1484_v5 }
 0x2b2   : > { %vm1836_vm4 = vcmp.ge.f32.partialorder %v1804_v30, 0.0  ;;  %v1868_v43 = vmul.f32 0.2, %v1804_v30 }
 0x2b4   : > { %v1900_v40 = vsel %vm1836_vm4, %v1804_v30, %v1868_v43 }
 0x2b5   : > { %1932 = vst.msk [vmem:[%s3739_s15 + $0xf8] sm:$0xff] %vm660_vm2, %v1900_v40 }
 0x2b6   : > { %2551 = shalt.err (!%p2548_p5)
}
 0x2b7   : > { %s2605_s7 = smov 128   ;;  %s2606_s8 = smov 8  }
 0x2b8   : > { %2376 = dma.vmem_to_hbm [thread:$0]  (%p2662_p4), %s1950_s24, 4096, %s1952_s12, %s1934_s25, %s2605_s7, %s2605_s7, %s2606_s8  }
 0x2b9 PF: > { %p2382_p6 = scmp.ge.s32.totalorder %s2602_s14, 2  ;;  %s1966_s27 = sand.u32 1, %s2582_s9  }
 0x2ba   : > { %s1967_s28 = scalar_lea.sflag [#allocation3], %s1966_s27 }
 0x2bb   : > { %p2379_p7 = pnand %p2382_p6, %p2669_p8 }
 0x2bd   : > { %p2380_p9 = pneg %p2379_p7 }
 0x2bf   : > { %2577 = dma.done.wait (%p2380_p9), %s1967_s28, 4096  }
 0x2c0   : > { %2579 = vsyncadd (%p2380_p9), %s1967_s28, 4294963200  ;;  %s15_s14 = sadd.s32 1, %s2602_s14   ;;  %s4077_s9 = smov %s2586_s10 }
 0x2c1   : > { %p12_p10 = scmp.ge.s32.totalorder %s15_s14, 4   ;;  %s4078_s10 = smov %s2590_s11 }
 0x2c2   : > { %s4079_s11 = smov %s2675_s22  ;;  %s4080_s12 = smov %s2598_s13 }
 0x2c3   : > { %s4081_s13 = smov %s4083_s17  ;;  %14 = sbr.rel (!%p12_p10) target bundleno = 4 (0x4), region = 65 }
 0x2c8   :  { %1973 = vsyncpa [#allocation3], 1 }
 0x2c9   :  { %1975 = vsyncpa [#allocation3 + $0x1], 1 }

</bundles_post_ra>
